<compile_context>
chip_gen: v7x
topology: tpu7x:2x2x1
jax: 0.10.0
libtpu: 0.0.40
codegen_flags: <defaults>
</compile_context>

<pallas_src>
import jax
import jax.numpy as jnp
from jax.experimental import pallas as pl
from jax.experimental.pallas import tpu as pltpu


def _fused_kernel(x_ref, w1_ref, s1_ref, w2_ref, s2_ref, o_ref):
    # x_ref : (1, H, W_pad, Cin)   bf16 full (width-padded) image of one batch element
    # w1_ref: (KH, KW, Cin, Cin)   bf16 conv1 weights (HWIO), BN1 scale folded in
    # s1_ref: (1, Cin)             f32 folded conv1 bias + BN1 shift
    # w2_ref: (Cin, Cout)          bf16 1x1 conv weights (IO), BN2 scale folded in
    # s2_ref: (1, Cout)            f32 folded conv2 bias + BN2 shift
    # o_ref : (1, TH, Wo, Cout)    f32 output row tile
    KH, KW = w1_ref.shape[0], w1_ref.shape[1]
    Cin = x_ref.shape[3]
    TH, Wo, Cout = o_ref.shape[1], o_ref.shape[2], o_ref.shape[3]
    W_slab = x_ref.shape[2] - (KW - 1)      # sublane-aligned working width (>= Wo)
    Hh = TH + KH - 1                        # input rows needed for TH output rows

    # Rows [r0, r0 + Hh) of the VMEM-resident image feed this output row tile.
    r0 = pl.program_id(1) * TH
    x_t = x_ref[0, pl.ds(r0, Hh)]           # (Hh, W_pad, Cin) bf16

    # conv1 (3x3, valid) as KH*KW matmuls contracting Cin on the MXU.  Per kw we take
    # one full-width shifted slab so the (Hh*W_slab, Cin) flatten and the per-kh row
    # windows stay tile-aligned (no per-tap relayout copies); columns >= Wo are junk
    # and are only dropped at the final store.
    acc = None                              # (TH*W_slab, Cin) f32
    for kw in range(KW):
        xf = x_t[:, kw:kw + W_slab, :].reshape(Hh * W_slab, Cin)
        for kh in range(KH):
            lhs = xf[kh * W_slab:kh * W_slab + TH * W_slab]
            c = jnp.dot(lhs, w1_ref[kh, kw], preferred_element_type=jnp.float32)
            acc = c if acc is None else acc + c

    # conv1 epilogue: folded (bias + BN) shift, ReLU6.  BN scale is already in w1.
    y = jnp.clip(acc + s1_ref[...], 0.0, 6.0)

    # conv2 (1x1) == channel matmul, folded shift, ReLU6.
    z = jnp.dot(y.astype(jnp.bfloat16), w2_ref[...],
                preferred_element_type=jnp.float32)
    z = jnp.clip(z + s2_ref[...], 0.0, 6.0)

    o_ref[0] = z.reshape(TH, W_slab, Cout)[:, :Wo, :].astype(o_ref.dtype)


def _round_up(x, m):
    return ((x + m - 1) // m) * m


def _pick_row_tile(ho, target):
    # Largest pipeline depth while keeping matmul M a few hundred rows: pick the
    # divisor of Ho closest to `target` output rows per tile.
    divs = [d for d in range(1, ho + 1) if ho % d == 0]
    return min(divs, key=lambda d: (abs(d - target), -d))


def depthwise_conv_forward(x_nchw, params, *, kernel_size=3, eps=1e-5,
                           target_rows=8):
    """x_nchw: (B, Cin, H, W) float32. Returns (B, Cout, Ho, Wo) float32."""
    B, Cin, H, W = x_nchw.shape
    KH = KW = kernel_size
    Ho, Wo = H - KH + 1, W - KW + 1
    Cout = params["w2"].shape[0]

    # ---- plain-JAX glue: layout conversion, width pad, BN folding, bf16 cast ----
    x_nhwc = jnp.transpose(x_nchw, (0, 2, 3, 1))                 # NCHW -> NHWC

    # Pad width so every kw-shifted slab inside the kernel is a multiple of the bf16
    # sublane pack (16): aligned flattens / row windows, no relayout copies.
    W_slab = _round_up(Wo, 16)
    W_pad = W_slab + KW - 1
    if W_pad > W:
        x_nhwc = jnp.pad(x_nhwc, ((0, 0), (0, 0), (0, W_pad - W), (0, 0)))

    # Fold BN (inference) scale into the conv weights, and all additive terms into a
    # single per-channel shift.  Done once on static params -> free at runtime.
    s1 = params["bn1_g"] * jax.lax.rsqrt(params["bn1_v"] + eps)
    t1 = params["bn1_b"] - params["bn1_m"] * s1
    s2 = params["bn2_g"] * jax.lax.rsqrt(params["bn2_v"] + eps)
    t2 = params["bn2_b"] - params["bn2_m"] * s2

    w1 = jnp.transpose(params["w1"], (2, 3, 1, 0)) * s1          # OIHW -> HWIO, *bn1
    shift1 = (params["b1"] * s1 + t1)[None, :].astype(jnp.float32)
    w2 = jnp.transpose(params["w2"][:, :, 0, 0], (1, 0)) * s2    # OI11 -> IO,  *bn2
    shift2 = (params["b2"] * s2 + t2)[None, :].astype(jnp.float32)

    x_bf = x_nhwc.astype(jnp.bfloat16)
    w1_bf = w1.astype(jnp.bfloat16)
    w2_bf = w2.astype(jnp.bfloat16)

    # Row tiling: TH output rows per grid step (TH | Ho).
    TH = _pick_row_tile(Ho, target_rows)
    n_th = Ho // TH

    grid_spec = pltpu.PrefetchScalarGridSpec(
        num_scalar_prefetch=0,
        grid=(B, n_th),
        in_specs=[
            # Full (padded) bf16 image per batch element; its block index is constant
            # along the row-tile axis, so it is fetched once per batch and stays
            # resident while the output / f32 intermediates are tiled.
            pl.BlockSpec((1, H, W_pad, Cin), lambda b, i: (b, 0, 0, 0)),
            pl.BlockSpec((KH, KW, Cin, Cin), lambda b, i: (0, 0, 0, 0)),
            pl.BlockSpec((1, Cin), lambda b, i: (0, 0)),
            pl.BlockSpec((Cin, Cout), lambda b, i: (0, 0)),
            pl.BlockSpec((1, Cout), lambda b, i: (0, 0)),
        ],
        out_specs=pl.BlockSpec((1, TH, Wo, Cout), lambda b, i: (b, i, 0, 0)),
    )

    flops = 2 * B * Ho * Wo * (KH * KW * Cin * Cin + Cin * Cout)
    bytes_accessed = (B * H * W_pad * Cin * 2 + KH * KW * Cin * Cin * 2
                      + Cin * Cout * 2 + (Cin + Cout) * 4
                      + B * Ho * Wo * Cout * 4)

    out_nhwc = pl.pallas_call(
        _fused_kernel,
        out_shape=jax.ShapeDtypeStruct((B, Ho, Wo, Cout), jnp.float32),
        grid_spec=grid_spec,
        compiler_params=pltpu.CompilerParams(
            dimension_semantics=("parallel", "parallel"),
            vmem_limit_bytes=32 * 1024 * 1024),
        cost_estimate=pl.CostEstimate(flops=flops, transcendentals=0,
                                      bytes_accessed=bytes_accessed),
    )(x_bf, w1_bf, shift1, w2_bf, shift2)

    return jnp.transpose(out_nhwc, (0, 3, 1, 2))                 # NHWC -> NCHW


def init_params(key, in_channels, out_channels, kernel_size=3):
    ks = jax.random.split(key, 8)
    p = {
        # conv1: PyTorch Conv2d weight layout (O, I, kH, kW)
        "w1": 0.1 * jax.random.normal(
            ks[0], (in_channels, in_channels, kernel_size, kernel_size),
            jnp.float32),
        "b1": 0.1 * jax.random.normal(ks[1], (in_channels,), jnp.float32),
        # conv2: 1x1, layout (O, I, 1, 1)
        "w2": 0.1 * jax.random.normal(
            ks[2], (out_channels, in_channels, 1, 1), jnp.float32),
        "b2": 0.1 * jax.random.normal(ks[3], (out_channels,), jnp.float32),
        # BatchNorm params (inference / running stats)
        "bn1_g": 1.0 + 0.1 * jax.random.normal(ks[4], (in_channels,), jnp.float32),
        "bn1_b": 0.1 * jax.random.normal(ks[5], (in_channels,), jnp.float32),
        "bn1_m": jnp.zeros((in_channels,), jnp.float32),
        "bn1_v": jnp.ones((in_channels,), jnp.float32),
        "bn2_g": 1.0 + 0.1 * jax.random.normal(ks[6], (out_channels,), jnp.float32),
        "bn2_b": 0.1 * jax.random.normal(ks[7], (out_channels,), jnp.float32),
        "bn2_m": jnp.zeros((out_channels,), jnp.float32),
        "bn2_v": jnp.ones((out_channels,), jnp.float32),
    }
    return p


def _reference(x_nchw, params, eps=1e-5):
    """Pure-JAX f32 reference (eval-mode BN) for a correctness sanity check."""
    x = jnp.transpose(x_nchw, (0, 2, 3, 1))
    w1 = jnp.transpose(params["w1"], (2, 3, 1, 0))
    y = jax.lax.conv_general_dilated(
        x, w1, window_strides=(1, 1), padding="VALID",
        dimension_numbers=("NHWC", "HWIO", "NHWC"))
    y = y + params["b1"]
    y = (y - params["bn1_m"]) / jnp.sqrt(params["bn1_v"] + eps)
    y = y * params["bn1_g"] + params["bn1_b"]
    y = jnp.clip(y, 0.0, 6.0)
    w2 = jnp.transpose(params["w2"], (2, 3, 1, 0))
    z = jax.lax.conv_general_dilated(
        y, w2, window_strides=(1, 1), padding="VALID",
        dimension_numbers=("NHWC", "HWIO", "NHWC"))
    z = z + params["b2"]
    z = (z - params["bn2_m"]) / jnp.sqrt(params["bn2_v"] + eps)
    z = z * params["bn2_g"] + params["bn2_b"]
    z = jnp.clip(z, 0.0, 6.0)
    return jnp.transpose(z, (0, 3, 1, 2))


if __name__ == "__main__":
    B, Cin, Cout, H, W = 2, 4, 8, 16, 16
    key = jax.random.PRNGKey(0)
    kx, kp = jax.random.split(key)
    x = jax.random.normal(kx, (B, Cin, H, W), jnp.float32)
    params = init_params(kp, Cin, Cout, kernel_size=3)

    out = depthwise_conv_forward(x, params, kernel_size=3)
    out = jax.block_until_ready(out)

    ref = _reference(x, params)
    assert out.shape == (B, Cout, H - 2, W - 2), out.shape
    # bf16 matmul operands -> compare against the f32 reference at bf16 tolerance.
    assert jnp.allclose(out, ref, atol=5e-2, rtol=5e-2), \
        float(jnp.max(jnp.abs(out - ref)))

    print("KERNEL_OK")
</pallas_src>

<mosaic_0001>
module attributes {stable_mosaic.version = 11 : i64} {
  func.func @_fused_kernel(%arg0: i32, %arg1: i32, %arg2: memref<1x16x18x4xbf16, #tpu.memory_space<vmem>>, %arg3: memref<3x3x4x4xbf16, #tpu.memory_space<vmem>>, %arg4: memref<1x4xf32, #tpu.memory_space<vmem>>, %arg5: memref<4x8xbf16, #tpu.memory_space<vmem>>, %arg6: memref<1x8xf32, #tpu.memory_space<vmem>>, %arg7: memref<1x7x14x8xf32, #tpu.memory_space<vmem>>) attributes {dimension_semantics = [#tpu.dimension_semantics<parallel>, #tpu.dimension_semantics<parallel>], iteration_bounds = array<i64: 2, 2>, scalar_prefetch = 0 : i64, scratch_operands = 0 : i64, tpu.core_type = #tpu.core_type<tc>, window_params = [{transform_indices = @transform_0, window_bounds = array<i64: 1, 16, 18, 4>}, {pipeline_mode = #tpu.pipeline_mode<synchronous>, transform_indices = @transform_1, window_bounds = array<i64: 3, 3, 4, 4>}, {pipeline_mode = #tpu.pipeline_mode<synchronous>, transform_indices = @transform_2, window_bounds = array<i64: 1, 4>}, {pipeline_mode = #tpu.pipeline_mode<synchronous>, transform_indices = @transform_3, window_bounds = array<i64: 4, 8>}, {pipeline_mode = #tpu.pipeline_mode<synchronous>, transform_indices = @transform_4, window_bounds = array<i64: 1, 8>}, {transform_indices = @transform_5, window_bounds = array<i64: 1, 7, 14, 8>}]} {
    %c7_i32 = arith.constant 7 : i32
    %0 = arith.muli %arg1, %c7_i32 : i32
    %c0 = arith.constant 0 : index
    %1 = arith.index_cast %0 : i32 to index
    %c0_0 = arith.constant 0 : index
    %c0_1 = arith.constant 0 : index
    %2 = vector.load %arg2[%c0, %1, %c0_0, %c0_1] : memref<1x16x18x4xbf16, #tpu.memory_space<vmem>>, vector<1x9x18x4xbf16>
    %3 = vector.shape_cast %2 : vector<1x9x18x4xbf16> to vector<9x18x4xbf16>
    %4 = vector.extract_strided_slice %3 {offsets = [0, 0, 0], sizes = [9, 16, 4], strides = [1, 1, 1]} : vector<9x18x4xbf16> to vector<9x16x4xbf16>
    %5 = vector.shape_cast %4 : vector<9x16x4xbf16> to vector<144x4xbf16>
    %6 = vector.extract_strided_slice %5 {offsets = [0, 0], sizes = [112, 4], strides = [1, 1]} : vector<144x4xbf16> to vector<112x4xbf16>
    %c0_2 = arith.constant 0 : index
    %c0_3 = arith.constant 0 : index
    %c0_4 = arith.constant 0 : index
    %c0_5 = arith.constant 0 : index
    %7 = vector.load %arg3[%c0_2, %c0_3, %c0_4, %c0_5] : memref<3x3x4x4xbf16, #tpu.memory_space<vmem>>, vector<1x1x4x4xbf16>
    %8 = vector.shape_cast %7 : vector<1x1x4x4xbf16> to vector<4x4xbf16>
    %cst = arith.constant dense<0.000000e+00> : vector<112x4xf32>
    %9 = tpu.matmul %6, %8, %cst {dimension_numbers = #tpu.dot_dimension_numbers<[1], [0], [0], [1], [0, 0, 1, 1], [], []>} : vector<112x4xbf16>, vector<4x4xbf16>, vector<112x4xf32> -> vector<112x4xf32>
    %10 = vector.extract_strided_slice %5 {offsets = [16, 0], sizes = [112, 4], strides = [1, 1]} : vector<144x4xbf16> to vector<112x4xbf16>
    %c1 = arith.constant 1 : index
    %c0_6 = arith.constant 0 : index
    %c0_7 = arith.constant 0 : index
    %c0_8 = arith.constant 0 : index
    %11 = vector.load %arg3[%c1, %c0_6, %c0_7, %c0_8] : memref<3x3x4x4xbf16, #tpu.memory_space<vmem>>, vector<1x1x4x4xbf16>
    %12 = vector.shape_cast %11 : vector<1x1x4x4xbf16> to vector<4x4xbf16>
    %cst_9 = arith.constant dense<0.000000e+00> : vector<112x4xf32>
    %13 = tpu.matmul %10, %12, %cst_9 {dimension_numbers = #tpu.dot_dimension_numbers<[1], [0], [0], [1], [0, 0, 1, 1], [], []>} : vector<112x4xbf16>, vector<4x4xbf16>, vector<112x4xf32> -> vector<112x4xf32>
    %14 = arith.addf %9, %13 : vector<112x4xf32>
    %15 = vector.extract_strided_slice %5 {offsets = [32, 0], sizes = [112, 4], strides = [1, 1]} : vector<144x4xbf16> to vector<112x4xbf16>
    %c2 = arith.constant 2 : index
    %c0_10 = arith.constant 0 : index
    %c0_11 = arith.constant 0 : index
    %c0_12 = arith.constant 0 : index
    %16 = vector.load %arg3[%c2, %c0_10, %c0_11, %c0_12] : memref<3x3x4x4xbf16, #tpu.memory_space<vmem>>, vector<1x1x4x4xbf16>
    %17 = vector.shape_cast %16 : vector<1x1x4x4xbf16> to vector<4x4xbf16>
    %cst_13 = arith.constant dense<0.000000e+00> : vector<112x4xf32>
    %18 = tpu.matmul %15, %17, %cst_13 {dimension_numbers = #tpu.dot_dimension_numbers<[1], [0], [0], [1], [0, 0, 1, 1], [], []>} : vector<112x4xbf16>, vector<4x4xbf16>, vector<112x4xf32> -> vector<112x4xf32>
    %19 = arith.addf %14, %18 : vector<112x4xf32>
    %20 = vector.extract_strided_slice %3 {offsets = [0, 1, 0], sizes = [9, 16, 4], strides = [1, 1, 1]} : vector<9x18x4xbf16> to vector<9x16x4xbf16>
    %21 = vector.shape_cast %20 : vector<9x16x4xbf16> to vector<144x4xbf16>
    %22 = vector.extract_strided_slice %21 {offsets = [0, 0], sizes = [112, 4], strides = [1, 1]} : vector<144x4xbf16> to vector<112x4xbf16>
    %c0_14 = arith.constant 0 : index
    %c1_15 = arith.constant 1 : index
    %c0_16 = arith.constant 0 : index
    %c0_17 = arith.constant 0 : index
    %23 = vector.load %arg3[%c0_14, %c1_15, %c0_16, %c0_17] : memref<3x3x4x4xbf16, #tpu.memory_space<vmem>>, vector<1x1x4x4xbf16>
    %24 = vector.shape_cast %23 : vector<1x1x4x4xbf16> to vector<4x4xbf16>
    %cst_18 = arith.constant dense<0.000000e+00> : vector<112x4xf32>
    %25 = tpu.matmul %22, %24, %cst_18 {dimension_numbers = #tpu.dot_dimension_numbers<[1], [0], [0], [1], [0, 0, 1, 1], [], []>} : vector<112x4xbf16>, vector<4x4xbf16>, vector<112x4xf32> -> vector<112x4xf32>
    %26 = arith.addf %19, %25 : vector<112x4xf32>
    %27 = vector.extract_strided_slice %21 {offsets = [16, 0], sizes = [112, 4], strides = [1, 1]} : vector<144x4xbf16> to vector<112x4xbf16>
    %c1_19 = arith.constant 1 : index
    %c1_20 = arith.constant 1 : index
    %c0_21 = arith.constant 0 : index
    %c0_22 = arith.constant 0 : index
    %28 = vector.load %arg3[%c1_19, %c1_20, %c0_21, %c0_22] : memref<3x3x4x4xbf16, #tpu.memory_space<vmem>>, vector<1x1x4x4xbf16>
    %29 = vector.shape_cast %28 : vector<1x1x4x4xbf16> to vector<4x4xbf16>
    %cst_23 = arith.constant dense<0.000000e+00> : vector<112x4xf32>
    %30 = tpu.matmul %27, %29, %cst_23 {dimension_numbers = #tpu.dot_dimension_numbers<[1], [0], [0], [1], [0, 0, 1, 1], [], []>} : vector<112x4xbf16>, vector<4x4xbf16>, vector<112x4xf32> -> vector<112x4xf32>
    %31 = arith.addf %26, %30 : vector<112x4xf32>
    %32 = vector.extract_strided_slice %21 {offsets = [32, 0], sizes = [112, 4], strides = [1, 1]} : vector<144x4xbf16> to vector<112x4xbf16>
    %c2_24 = arith.constant 2 : index
    %c1_25 = arith.constant 1 : index
    %c0_26 = arith.constant 0 : index
    %c0_27 = arith.constant 0 : index
    %33 = vector.load %arg3[%c2_24, %c1_25, %c0_26, %c0_27] : memref<3x3x4x4xbf16, #tpu.memory_space<vmem>>, vector<1x1x4x4xbf16>
    %34 = vector.shape_cast %33 : vector<1x1x4x4xbf16> to vector<4x4xbf16>
    %cst_28 = arith.constant dense<0.000000e+00> : vector<112x4xf32>
    %35 = tpu.matmul %32, %34, %cst_28 {dimension_numbers = #tpu.dot_dimension_numbers<[1], [0], [0], [1], [0, 0, 1, 1], [], []>} : vector<112x4xbf16>, vector<4x4xbf16>, vector<112x4xf32> -> vector<112x4xf32>
    %36 = arith.addf %31, %35 : vector<112x4xf32>
    %37 = vector.extract_strided_slice %3 {offsets = [0, 2, 0], sizes = [9, 16, 4], strides = [1, 1, 1]} : vector<9x18x4xbf16> to vector<9x16x4xbf16>
    %38 = vector.shape_cast %37 : vector<9x16x4xbf16> to vector<144x4xbf16>
    %39 = vector.extract_strided_slice %38 {offsets = [0, 0], sizes = [112, 4], strides = [1, 1]} : vector<144x4xbf16> to vector<112x4xbf16>
    %c0_29 = arith.constant 0 : index
    %c2_30 = arith.constant 2 : index
    %c0_31 = arith.constant 0 : index
    %c0_32 = arith.constant 0 : index
    %40 = vector.load %arg3[%c0_29, %c2_30, %c0_31, %c0_32] : memref<3x3x4x4xbf16, #tpu.memory_space<vmem>>, vector<1x1x4x4xbf16>
    %41 = vector.shape_cast %40 : vector<1x1x4x4xbf16> to vector<4x4xbf16>
    %cst_33 = arith.constant dense<0.000000e+00> : vector<112x4xf32>
    %42 = tpu.matmul %39, %41, %cst_33 {dimension_numbers = #tpu.dot_dimension_numbers<[1], [0], [0], [1], [0, 0, 1, 1], [], []>} : vector<112x4xbf16>, vector<4x4xbf16>, vector<112x4xf32> -> vector<112x4xf32>
    %43 = arith.addf %36, %42 : vector<112x4xf32>
    %44 = vector.extract_strided_slice %38 {offsets = [16, 0], sizes = [112, 4], strides = [1, 1]} : vector<144x4xbf16> to vector<112x4xbf16>
    %c1_34 = arith.constant 1 : index
    %c2_35 = arith.constant 2 : index
    %c0_36 = arith.constant 0 : index
    %c0_37 = arith.constant 0 : index
    %45 = vector.load %arg3[%c1_34, %c2_35, %c0_36, %c0_37] : memref<3x3x4x4xbf16, #tpu.memory_space<vmem>>, vector<1x1x4x4xbf16>
    %46 = vector.shape_cast %45 : vector<1x1x4x4xbf16> to vector<4x4xbf16>
    %cst_38 = arith.constant dense<0.000000e+00> : vector<112x4xf32>
    %47 = tpu.matmul %44, %46, %cst_38 {dimension_numbers = #tpu.dot_dimension_numbers<[1], [0], [0], [1], [0, 0, 1, 1], [], []>} : vector<112x4xbf16>, vector<4x4xbf16>, vector<112x4xf32> -> vector<112x4xf32>
    %48 = arith.addf %43, %47 : vector<112x4xf32>
    %49 = vector.extract_strided_slice %38 {offsets = [32, 0], sizes = [112, 4], strides = [1, 1]} : vector<144x4xbf16> to vector<112x4xbf16>
    %c2_39 = arith.constant 2 : index
    %c2_40 = arith.constant 2 : index
    %c0_41 = arith.constant 0 : index
    %c0_42 = arith.constant 0 : index
    %50 = vector.load %arg3[%c2_39, %c2_40, %c0_41, %c0_42] : memref<3x3x4x4xbf16, #tpu.memory_space<vmem>>, vector<1x1x4x4xbf16>
    %51 = vector.shape_cast %50 : vector<1x1x4x4xbf16> to vector<4x4xbf16>
    %cst_43 = arith.constant dense<0.000000e+00> : vector<112x4xf32>
    %52 = tpu.matmul %49, %51, %cst_43 {dimension_numbers = #tpu.dot_dimension_numbers<[1], [0], [0], [1], [0, 0, 1, 1], [], []>} : vector<112x4xbf16>, vector<4x4xbf16>, vector<112x4xf32> -> vector<112x4xf32>
    %53 = arith.addf %48, %52 : vector<112x4xf32>
    %c0_44 = arith.constant 0 : index
    %c0_45 = arith.constant 0 : index
    %54 = vector.load %arg4[%c0_44, %c0_45] : memref<1x4xf32, #tpu.memory_space<vmem>>, vector<1x4xf32>
    %55 = vector.broadcast %54 : vector<1x4xf32> to vector<112x4xf32>
    %56 = arith.addf %53, %55 : vector<112x4xf32>
    %cst_46 = arith.constant 0.000000e+00 : f32
    %cst_47 = arith.constant 6.000000e+00 : f32
    %57 = vector.broadcast %cst_46 : f32 to vector<112x4xf32>
    %58 = arith.maximumf %57, %56 : vector<112x4xf32>
    %59 = vector.broadcast %cst_47 : f32 to vector<112x4xf32>
    %60 = arith.minimumf %59, %58 : vector<112x4xf32>
    %61 = arith.truncf %60 : vector<112x4xf32> to vector<112x4xbf16>
    %c0_48 = arith.constant 0 : index
    %c0_49 = arith.constant 0 : index
    %62 = vector.load %arg5[%c0_48, %c0_49] : memref<4x8xbf16, #tpu.memory_space<vmem>>, vector<4x8xbf16>
    %cst_50 = arith.constant dense<0.000000e+00> : vector<112x8xf32>
    %63 = tpu.matmul %61, %62, %cst_50 {dimension_numbers = #tpu.dot_dimension_numbers<[1], [0], [0], [1], [0, 0, 1, 1], [], []>} : vector<112x4xbf16>, vector<4x8xbf16>, vector<112x8xf32> -> vector<112x8xf32>
    %c0_51 = arith.constant 0 : index
    %c0_52 = arith.constant 0 : index
    %64 = vector.load %arg6[%c0_51, %c0_52] : memref<1x8xf32, #tpu.memory_space<vmem>>, vector<1x8xf32>
    %65 = vector.broadcast %64 : vector<1x8xf32> to vector<112x8xf32>
    %66 = arith.addf %63, %65 : vector<112x8xf32>
    %cst_53 = arith.constant 0.000000e+00 : f32
    %cst_54 = arith.constant 6.000000e+00 : f32
    %67 = vector.broadcast %cst_53 : f32 to vector<112x8xf32>
    %68 = arith.maximumf %67, %66 : vector<112x8xf32>
    %69 = vector.broadcast %cst_54 : f32 to vector<112x8xf32>
    %70 = arith.minimumf %69, %68 : vector<112x8xf32>
    %71 = vector.shape_cast %70 : vector<112x8xf32> to vector<7x16x8xf32>
    %72 = vector.extract_strided_slice %71 {offsets = [0, 0, 0], sizes = [7, 14, 8], strides = [1, 1, 1]} : vector<7x16x8xf32> to vector<7x14x8xf32>
    %c0_55 = arith.constant 0 : index
    %c0_56 = arith.constant 0 : index
    %c0_57 = arith.constant 0 : index
    %c0_58 = arith.constant 0 : index
    %73 = vector.load %arg7[%c0_55, %c0_56, %c0_57, %c0_58] : memref<1x7x14x8xf32, #tpu.memory_space<vmem>>, vector<1x7x14x8xf32>
    %74 = vector.shape_cast %73 : vector<1x7x14x8xf32> to vector<7x14x8xf32>
    %75 = vector.shape_cast %72 : vector<7x14x8xf32> to vector<1x7x14x8xf32>
    tpu.vector_store %arg7[%c0_55, %c0_56, %c0_57, %c0_58], %75 {strides = array<i32>} : memref<1x7x14x8xf32, #tpu.memory_space<vmem>>, vector<1x7x14x8xf32>,
    return
  }
  func.func @transform_0(%arg0: i32, %arg1: i32) -> (i32, i32, i32, i32) {
    %c0_i32 = arith.constant 0 : i32
    %c0_i32_0 = arith.constant 0 : i32
    %c0_i32_1 = arith.constant 0 : i32
    %c0_i32_2 = arith.constant 0 : i32
    return %arg0, %c0_i32, %c0_i32_0, %c0_i32_1 : i32, i32, i32, i32
  }
  func.func @transform_1(%arg0: i32, %arg1: i32) -> (i32, i32, i32, i32) {
    %c0_i32 = arith.constant 0 : i32
    %c0_i32_0 = arith.constant 0 : i32
    %c0_i32_1 = arith.constant 0 : i32
    %c0_i32_2 = arith.constant 0 : i32
    %c0_i32_3 = arith.constant 0 : i32
    return %c0_i32, %c0_i32_0, %c0_i32_1, %c0_i32_2 : i32, i32, i32, i32
  }
  func.func @transform_2(%arg0: i32, %arg1: i32) -> (i32, i32) {
    %c0_i32 = arith.constant 0 : i32
    %c0_i32_0 = arith.constant 0 : i32
    %c0_i32_1 = arith.constant 0 : i32
    return %c0_i32, %c0_i32_0 : i32, i32
  }
  func.func @transform_3(%arg0: i32, %arg1: i32) -> (i32, i32) {
    %c0_i32 = arith.constant 0 : i32
    %c0_i32_0 = arith.constant 0 : i32
    %c0_i32_1 = arith.constant 0 : i32
    return %c0_i32, %c0_i32_0 : i32, i32
  }
  func.func @transform_4(%arg0: i32, %arg1: i32) -> (i32, i32) {
    %c0_i32 = arith.constant 0 : i32
    %c0_i32_0 = arith.constant 0 : i32
    %c0_i32_1 = arith.constant 0 : i32
    return %c0_i32, %c0_i32_0 : i32, i32
  }
  func.func @transform_5(%arg0: i32, %arg1: i32) -> (i32, i32, i32, i32) {
    %c0_i32 = arith.constant 0 : i32
    %c0_i32_0 = arith.constant 0 : i32
    %c0_i32_1 = arith.constant 0 : i32
    return %arg0, %arg1, %c0_i32, %c0_i32_0 : i32, i32, i32, i32
  }
}

</mosaic_0001>

<bundles_post_ra>
// kernel: tpu_custom_call.1
= control target key start
LH: loop header
LB: loop body
LE: loop exit
PB: predicated region body
PF: predicated region fallthrough
CT: control target
= control target key end

     0   :  { %s2648_s18 = smov 0   ;;  %s2650_s19 = smov 0   ;;  %s3527_s0 = inlined_call_operand.vmem [shape: bf16[2,16,18,4], index: 0, kind: input, shape index: {}]   ;;  %s3528_s1 = inlined_call_operand.vmem [shape: bf16[3,3,4,4], index: 1, kind: input, shape index: {}]   ;;  %s3529_s2 = inlined_call_operand.vmem [shape: f32[1,4], index: 2, kind: input, shape index: {}]   ;;  %s3530_s3 = inlined_call_operand.vmem [shape: bf16[4,8], index: 3, kind: input, shape index: {}]   ;;  %s3531_s4 = inlined_call_operand.vmem [shape: f32[1,8], index: 4, kind: input, shape index: {}]   ;;  %s3532_s5 = inlined_call_operand.vmem [shape: f32[2,14,14,8], index: 5, kind: output, shape index: {}]  }
   0x1   :  { %s2652_s20 = smov 0   ;;  %s2654_s21 = smov 0  }
   0x2   :  { %s2656_s22 = smov 0  }
   0x3 LB: > { %s24_s23 = sadd.s32 1, %s2606_s20  ;;  %s27_s24 = sadd.s32 1, %s2610_s21  ;;  %s2614_s22 = sphi %s2656_s22, %s15_s22   ;;  %s2610_s21 = sphi %s2654_s21, %s3540_s21   ;;  %s2606_s20 = sphi %s2652_s20, %s3539_s20   ;;  %s2602_s19 = sphi %s2650_s19, %s3538_s19   ;;  %s2598_s18 = sphi %s2648_s18, %s3537_s18  }
   0x4   : > { %p25_p0 = scmp.ge.s32.totalorder %s24_s23, 2  ;;  %p2018_p1 = scmp.ge.s32.totalorder %s2614_s22, 1 }
   0x5   : > { %p201_p2 = scmp.lt.s32.totalorder %s2614_s22, 5 }
   0x6   : > { %s3542_s23 = smov (%p25_p0, %s24_s23), 0  ;;  %s3544_s24 = smov (!%p25_p0, %s27_s24), %s2610_s21 }
   0x7   : > { %p202_p3 = pnand %p2018_p1, %p201_p2  ;;  %p29_p4 = scmp.ge.s32.totalorder %s3544_s24, 2 }
   0x8   : > { %v2024_v0 = vld [vmem:[%s3528_s1 + $0x6] sm:$0x3] (!%p202_p3)  ;;  %vm342_vm0 = vcmask (!%p202_p3), 1041408   ;;  %v282_v1 = vld [vmem:[%s3528_s1] sm:$0x3] (!%p202_p3)  ;;  %v2616_v2 = vmov (!%p202_p3), 0.0  }
   0x9   : > { %s3546_s24 = smov (%p29_p4, %s3544_s24), 0  ;;  %205 = sbr.rel (%p202_p3) target bundleno = 741 (0x2e5), region = 40 }
   0xa   : > { %2223 = vmatprep.subr.bf16.mxu0 (!%p202_p3), %v2616_v2  ;;  %v344_v3 = vsel (!%p202_p3), %vm342_vm0, %v2024_v0, 0  ;;  %2253 = vmatprep.subr.bf16.mxu1 (!%p202_p3), %v2616_v2  ;;  %v444_v4 = vsel (!%p202_p3), %vm342_vm0, %v282_v1, 0  ;;  %p234_p5 = scmp.lt.s32.totalorder (!%p202_p3), %s2602_s19, 1  ;;  %vm2617_vm1 = vmmov (!%p202_p3), 0   ;;  %s2142_s29 = smul.u32 (!%p202_p3), 84, %s2598_s18  ;;  %vm320_vm2 = vcmask (!%p202_p3), 31744  }
   0xb   : > { %2224 = vmatpush3.bf16.msra.mxu0 (!%p202_p3), %v344_v3  ;;  %2254 = vmatpush3.bf16.msra.mxu1 (!%p202_p3), %v444_v4  ;;  %v2047_v5 = vld [vmem:[%s3528_s1 + $0xc] sm:$0x3] (!%p202_p3)  ;;  %v2056_v6 = vld [vmem:[%s3528_s1 + $0x2] sm:$0x3] (!%p202_p3)  ;;  %vm651_vm3 = vsmask.f32 (!%p202_p3), 3328 }
   0xc   : > { %2225 = vmatprep.mubr.msk.bf16.mxu0 (!%p202_p3), %vm2617_vm1, %v2616_v2  ;;  %2255 = vmatprep.mubr.msk.bf16.mxu1 (!%p202_p3), %vm2617_vm1, %v2616_v2  ;;  %v546_v12 = vsel (!%p202_p3), %vm342_vm0, %v2047_v5, 0  ;;  %v915_v14 = vsel (!%p202_p3), %vm342_vm0, %v2056_v6, 0  ;;  %vm652_vm4 = vsmask.f32 (!%p202_p3), 7440  ;;  %vm1257_vm6 = vcmask (!%p202_p3), 1042432   ;;  %s239_s10 = smul.u32 (!%p202_p3), 7, %s2598_s18 }
   0xd   : > { %2283 = vmatprep.subr.bf16.mxu0 (!%p202_p3), %v2616_v2  ;;  %2313 = vmatprep.subr.bf16.mxu1 (!%p202_p3), %v2616_v2  ;;  %vm2843_vm5 = vmor (!%p202_p3), %vm651_vm3, %vm652_vm4  ;;  %vm1258_vm7 = vcmask (!%p202_p3), 1046532   ;;  %vm1906_vm9 = vcmask (!%p202_p3), 64512   ;;  %vm1908_vm10 = vcmask (!%p202_p3), 62464  }
   0xe   : > { %vm2862_vm8 = vmor (!%p202_p3), %vm1257_vm6, %vm1258_vm7  ;;  %p242_p6 = scmp.lt.s32.totalorder (!%p202_p3), %s239_s10, 13 }
  0x10   : > { %s3548_s19 = smov (!%p234_p5, %s2602_s19), 1  ;;  %s3550_s10 = smov (!%p242_p6, %s239_s10), 13 }
  0x11   : > { %s2523_s30 = smul.u32 192, %s3548_s19  ;;  %s2020_s12 = sshll.u32 %s3550_s10, 1 }
  0x13   : > { %s238_s8 = scalar_lea.vmem %s3527_s0, %s2523_s30 }
  0x14   : > { %s2706_s11 = scalar_lea.vmem %s238_s8, %s2142_s29 }
  0x15   : > { %v2712_v7 = vld [vmem:[%s2706_s11 + $0xc] sm:$0xf]  ;;  %v2715_v8 = vld [vmem:[%s2706_s11 + $0x10] sm:$0xf]  ;;  %v2718_v9 = vld [vmem:[%s2706_s11] sm:$0xf] }
  0x16   : > { %v2025_v10 = vcombine.low %v2712_v7, %v2715_v8  ;;  %v2723_v11 = vld [vmem:[%s2706_s11 + $0x4] sm:$0xf]  ;;  %v2732_v15 = vld [vmem:[%s2706_s11 + $0x18] sm:$0xf]  ;;  %v2735_v16 = vld [vmem:[%s2706_s11 + $0x1c] sm:$0xf] }
  0x17   : > { %v2039_v13 = vcombine.low %v2718_v9, %v2723_v11  ;;  %v2744_v17 = vcombine.low %v2732_v15, %v2735_v16  ;;  %v2753_v18 = vld [vmem:[%s2706_s11 + $0x24] sm:$0xf]  ;;  %v2756_v19 = vld [vmem:[%s2706_s11 + $0x28] sm:$0xf]  ;;  %v2771_v21 = vld [vmem:[%s2706_s11 + $0x30] sm:$0xf] }
  0x18   : > { %2226 = vmatmul.mubr.msk.bf16.vlgmr.msra.gmra.mrb[0].mxu0 %vm320_vm2, %v2025_v10  ;;  %v2762_v20 = vcombine.low %v2753_v18, %v2756_v19  ;;  %v2774_v22 = vld [vmem:[%s2706_s11 + $0x34] sm:$0xf]  ;;  %v2789_v24 = vld [vmem:[%s2706_s11 + $0x3c] sm:$0xf]  ;;  %v2792_v25 = vld [vmem:[%s2706_s11 + $0x40] sm:$0xf] }
  0x19   : > { %2256 = vmatmul.mubr.msk.bf16.vlgmr.msra.gmra.mrb[0].mxu1 %vm320_vm2, %v2039_v13  ;;  %2284 = vmatpush3.bf16.msra.mxu0 %v546_v12  ;;  %v2780_v23 = vcombine.low %v2771_v21, %v2774_v22  ;;  %v2795_v26 = vld [vmem:[%s2706_s11 + $0x54] sm:$0xf]  ;;  %v2801_v28 = vld [vmem:[%s2706_s11 + $0x58] sm:$0xf]  ;;  %v2806_v30 = vcombine.low %v2789_v24, %v2792_v25  ;;  %v2810_v32 = vld [vmem:[%s2706_s11 + $0x5c] sm:$0x1] }
  0x1a   : > { %2229 = vmatprep.mubr.msk.bf16.mxu0 %vm2617_vm1, %v2616_v2  ;;  %2259 = vmatprep.mubr.msk.bf16.mxu1 %vm2617_vm1, %v2616_v2  ;;  %v823_v27 = vshrl.u32 %v2795_v26, 16  ;;  %v826_v29 = vshll.u32 %v2795_v26, 16  ;;  %v836_v31 = vshrl.u32 %v2801_v28, 16  ;;  %v655_v34 = vshrl.u32 %v2718_v9, 16  ;;  %v2825_v42 = vld [vmem:[%s2706_s11 + $0x48] sm:$0xf] }
  0x1b   : > { %2314 = vmatpush3.bf16.msra.mxu1 %v915_v14  ;;  %2343 = vmatprep.subr.bf16.mxu0 %v2616_v2  ;;  %v658_v35 = vshll.u32 %v2718_v9, 16  ;;  %v832_v37 = vshll.u32 %v2801_v28, 16  ;;  %v664_v38 = vshll.u32 %v2723_v11, 16  ;;  %v668_v39 = vshrl.u32 %v2723_v11, 16  ;;  %v2828_v43 = vld [vmem:[%s2706_s11 + $0x4c] sm:$0xf] }
  0x1c   : > { %2373 = vmatprep.subr.bf16.mxu1 %v2616_v2  ;;  %v825_v33 = vrot.slane %v823_v27, 4  ;;  %v828_v36 = vrot.slane %v826_v29, 5  ;;  %v1262_v40 = vrot.slane %v2723_v11, 5  ;;  %v838_v41 = vrot.slane %v836_v31, 4  ;;  %v260_v60 = vld [vmem:[%s2706_s11 + $0x14] sm:$0x1] }
  0x1d   : > { %v834_v45 = vrot.slane %v832_v37, 5  ;;  %v842_v46 = vshll.u32 %v2810_v32, 16  ;;  %v2090_v47 = vrot.slane %v2712_v7, 9  ;;  %v1269_v48 = vrot.slane %v2715_v8, 5  ;;  %v257_v3 = vld [vmem:[%s2706_s11 + $0x8] sm:$0x1] }
  0x1e   : > { %v829_v44 = vor.u32 %v828_v36, %v825_v33  ;;  %v657_v49 = vrot.slane %v655_v34, 4  ;;  %v660_v53 = vrot.slane %v658_v35, 5  ;;  %v2835_v54 = vrot.slane %v664_v38, 5 }
  0x1f   : > { %v839_v51 = vor.u32 %v838_v41, %v834_v45  ;;  %v844_v52 = vrot.slane %v842_v46, 5  ;;  %v670_v55 = vrot.slane %v668_v39, 4  ;;  %v2839_v56 = vcombine.low %v2825_v42, %v2828_v43 }
  0x20   : > { %2230 = vmatmul.mubr.msk.bf16.gmra.mrb[4].mxu0 %vm320_vm2, %v2744_v17  ;;  %v830_v50 = vrot.slane %v829_v44, 4  ;;  %v2089_v58 = vrot.slane %v2718_v9, 9  ;;  %v1264_v59 = vrot.slane %v1262_v40, 4  ;;  %v679_v63 = vshrl.u32 %v2712_v7, 16 }
  0x21   : > { %2260 = vmatmul.mubr.msk.bf16.gmra.mrb[4].mxu1 %vm320_vm2, %v2025_v10  ;;  %2233 = vmatprep.mubr.msk.bf16.mxu0 %vm2617_vm1, %v2616_v2  ;;  %v840_v62 = vrot.slane %v839_v51, 4  ;;  %v682_v0 = vshll.u32 %v2712_v7, 16  ;;  %v1271_v1 = vrot.slane %v1269_v48, 4  ;;  %v1272_v4 = vrot.slane %v260_v60, 5 }
  0x22   : > { %2263 = vmatprep.mubr.msk.bf16.mxu1 %vm2617_vm1, %v2616_v2  ;;  %v835_v61 = vsel %vm2843_vm5, %v830_v50, %v834_v45  ;;  %v1265_v6 = vrot.slane %v257_v3, 5  ;;  %v692_v9 = vshrl.u32 %v2715_v8, 16  ;;  %v661_v10 = vor.u32 %v660_v53, %v657_v49  ;;  %v263_v45 = vld [vmem:[%s2706_s11 + $0x20] sm:$0x1] }
  0x23   : > { %v845_v5 = vsel %vm2843_vm5, %v840_v62, %v844_v52  ;;  %v671_v11 = vor.u32 %v670_v55, %v2835_v54  ;;  %v674_v13 = vshll.u32 %v257_v3, 16  ;;  %v2872_v14 = vsel %vm2862_vm8, %v2089_v58, %v1262_v40  ;;  %v2071_v52 = vld [vmem:[%s3528_s1 + $0x8] sm:$0x3] }
  0x24   : > { %v2860_v12 = vcombine.low %v835_v61, %v845_v5  ;;  %v2876_v27 = vsel %vm2862_vm8, %v1264_v59, %v1265_v6  ;;  %v1270_v29 = vsel %vm2862_vm8, %v2090_v47, %v1269_v48  ;;  %v688_v31 = vshll.u32 %v2715_v8, 16 }
  0x25   : > { %v2099_v33 = vcombine.low %v2872_v14, %v2876_v27  ;;  %v1273_v34 = vsel %vm2862_vm8, %v1271_v1, %v1272_v4  ;;  %v662_v36 = vrot.slane %v661_v10, 4  ;;  %v672_v37 = vrot.slane %v671_v11, 4 }
  0x26   : > { %v2887_v35 = vcombine.low %v1270_v29, %v1273_v34  ;;  %v2891_v38 = vcombine.low %v2795_v26, %v2801_v28  ;;  %v1276_v39 = vrot.slane %v2735_v16, 5  ;;  %v676_v40 = vrot.slane %v674_v13, 5 }
  0x27   : > { %v681_v41 = vrot.slane %v679_v63, 4  ;;  %v684_v44 = vrot.slane %v682_v0, 5  ;;  %v694_v8 = vrot.slane %v692_v9, 4  ;;  %v690_v46 = vrot.slane %v688_v31, 5 }
  0x28   : > { %2234 = vmatmul.mubr.msk.bf16.gmra.mrb[8].mxu0 %vm320_vm2, %v2762_v20  ;;  %v2091_v47 = vrot.slane %v2732_v15, 9  ;;  %v1278_v48 = vrot.slane %v1276_v39, 4  ;;  %v1279_v49 = vrot.slane %v263_v45, 5  ;;  %v703_v50 = vshrl.u32 %v2732_v15, 16 }
  0x29   : > { %2264 = vmatmul.mubr.msk.bf16.gmra.mrb[8].mxu1 %vm320_vm2, %v2744_v17  ;;  %2237 = vmatprep.mubr.msk.bf16.mxu0 %vm2617_vm1, %v2616_v2  ;;  %v706_v51 = vshll.u32 %v2732_v15, 16  ;;  %v698_v53 = vshll.u32 %v260_v60, 16  ;;  %v716_v59 = vshrl.u32 %v2735_v16, 16  ;;  %v685_v15 = vor.u32 %v684_v44, %v681_v41 }
  0x2a   : > { %2267 = vmatprep.mubr.msk.bf16.mxu1 %vm2617_vm1, %v2616_v2  ;;  %v1277_v55 = vsel %vm2862_vm8, %v2091_v47, %v1276_v39  ;;  %v1280_v58 = vsel %vm2862_vm8, %v1278_v48, %v1279_v49  ;;  %v712_v61 = vshll.u32 %v2735_v16, 16  ;;  %v667_v60 = vsel %vm2843_vm5, %v662_v36, %v2835_v54  ;;  %v2080_v16 = vld [vmem:[%s3528_s1 + $0xe] sm:$0x3]  ;;  %v266_v54 = vld [vmem:[%s2706_s11 + $0x2c] sm:$0x1] }
  0x2b   : > { %v2913_v62 = vcombine.low %v1277_v55, %v1280_v58  ;;  %v677_v63 = vsel %vm2843_vm5, %v672_v37, %v676_v40  ;;  %v695_v0 = vor.u32 %v694_v8, %v690_v46  ;;  %v1029_v1 = vsel %vm342_vm0, %v2071_v52, 0 }
  0x2c   : > { %v700_v3 = vrot.slane %v698_v53, 5  ;;  %v705_v4 = vrot.slane %v703_v50, 4  ;;  %v708_v5 = vrot.slane %v706_v51, 5  ;;  %v1283_v6 = vrot.slane %v2756_v19, 5 }
  0x2d   : > { %v2057_v9 = vcombine.low %v667_v60, %v677_v63  ;;  %v686_v10 = vrot.slane %v685_v15, 4  ;;  %v714_v11 = vrot.slane %v712_v61, 5  ;;  %v718_v13 = vrot.slane %v716_v59, 4  ;;  %v269_v61 = vld [vmem:[%s2706_s11 + $0x38] sm:$0x1] }
  0x2e   : > { %v696_v29 = vrot.slane %v695_v0, 4  ;;  %v2092_v31 = vrot.slane %v2753_v18, 9  ;;  %v1285_v34 = vrot.slane %v1283_v6, 4  ;;  %v1286_v36 = vrot.slane %v266_v54, 5 }
  0x2f   : > { %v727_v37 = vshrl.u32 %v2753_v18, 16  ;;  %v1143_v39 = vsel %vm342_vm0, %v2080_v16, 0  ;;  %v730_v40 = vshll.u32 %v2753_v18, 16  ;;  %v722_v41 = vshll.u32 %v263_v45, 16 }
  0x30   : > { %2238 = vmatmul.mubr.msk.bf16.gmra.mrb[12].mxu0 %vm320_vm2, %v2780_v23  ;;  %v1284_v44 = vsel %vm2862_vm8, %v2092_v31, %v1283_v6  ;;  %v1287_v8 = vsel %vm2862_vm8, %v1285_v34, %v1286_v36  ;;  %v740_v47 = vshrl.u32 %v2756_v19, 16  ;;  %v709_v48 = vor.u32 %v708_v5, %v705_v4 }
  0x31   : > { %2268 = vmatmul.mubr.msk.bf16.gmra.mrb[12].mxu1 %vm320_vm2, %v2762_v20  ;;  %2241 = vmatprep.mubr.msk.bf16.mxu0 %vm2617_vm1, %v2616_v2  ;;  %v719_v49 = vor.u32 %v718_v13, %v714_v11  ;;  %v2940_v50 = vcombine.low %v1284_v44, %v1287_v8  ;;  %v701_v18 = vsel %vm2843_vm5, %v696_v29, %v700_v3  ;;  %v736_v45 = vshll.u32 %v2756_v19, 16 }
  0x32   : > { %2271 = vmatprep.mubr.msk.bf16.mxu1 %vm2617_vm1, %v2616_v2  ;;  %v724_v51 = vrot.slane %v722_v41, 5  ;;  %v729_v52 = vrot.slane %v727_v37, 4  ;;  %v732_v53 = vrot.slane %v730_v40, 5  ;;  %v1290_v55 = vrot.slane %v2774_v22, 5  ;;  %v272_v41 = vld [vmem:[%s2706_s11 + $0x44] sm:$0x1] }
  0x33   : > { %v710_v59 = vrot.slane %v709_v48, 4  ;;  %v720_v15 = vrot.slane %v719_v49, 4  ;;  %v738_v60 = vrot.slane %v736_v45, 5  ;;  %v2093_v63 = vrot.slane %v2771_v21, 9 }
  0x34   : > { %v1292_v19 = vrot.slane %v1290_v55, 4  ;;  %v1293_v0 = vrot.slane %v269_v61, 5  ;;  %v733_v3 = vor.u32 %v732_v53, %v729_v52  ;;  %v746_v4 = vshll.u32 %v266_v54, 16 }
  0x35   : > { %v1291_v5 = vsel %vm2862_vm8, %v2093_v63, %v1290_v55  ;;  %v754_v6 = vshll.u32 %v2771_v21, 16  ;;  %v715_v13 = vsel %vm2843_vm5, %v710_v59, %v714_v11  ;;  %v1297_v36 = vrot.slane %v2792_v25, 5 }
  0x36   : > { %v1294_v16 = vsel %vm2862_vm8, %v1292_v19, %v1293_v0  ;;  %v734_v29 = vrot.slane %v733_v3, 4  ;;  %v748_v31 = vrot.slane %v746_v4, 5  ;;  %v2094_v8 = vrot.slane %v2789_v24, 9 }
  0x37   : > { %v1300_v11 = vrot.slane %v272_v41, 5  ;;  %v775_v48 = vshrl.u32 %v2789_v24, 16  ;;  %v778_v49 = vshll.u32 %v2789_v24, 16  ;;  %v788_v45 = vshrl.u32 %v2792_v25, 16 }
  0x38   : > { %2242 = vmatmul.mubr.msk.bf16.gmra.mrb[16].mxu0 %vm320_vm2, %v2806_v30  ;;  %v739_v24 = vsel %vm2843_vm5, %v734_v29, %v738_v60  ;;  %v784_v59 = vshll.u32 %v2792_v25, 16  ;;  %v799_v3 = vshrl.u32 %v2825_v42, 16  ;;  %v802_v4 = vshll.u32 %v2825_v42, 16 }
  0x39   : > { %2272 = vmatmul.mubr.msk.bf16.gmra.mrb[16].mxu1 %vm320_vm2, %v2780_v23  ;;  %2245 = vmatprep.mubr.msk.bf16.mxu0 %vm2617_vm1, %v2616_v2  ;;  %v777_v63 = vrot.slane %v775_v48, 4  ;;  %v780_v19 = vrot.slane %v778_v49, 5  ;;  %v1304_v57 = vrot.slane %v2828_v43, 5 }
  0x3a   : > { %2275 = vmatprep.mubr.msk.bf16.mxu1 %vm2617_vm1, %v2616_v2  ;;  %v801_v29 = vrot.slane %v799_v3, 4 }
  0x3b   : > { %v781_v25 = vor.u32 %v780_v19, %v777_v63  ;;  %v1306_v14 = vrot.slane %v1304_v57, 4 }
  0x40   : > { %2246 = vmatmul.mubr.msk.bf16.gmra.mrb[20].mxu0 %vm320_vm2, %v2839_v56 }
  0x41   : > { %2276 = vmatmul.mubr.msk.bf16.gmra.mrb[20].mxu1 %vm320_vm2, %v2806_v30  ;;  %2249 = vmatprep.mubr.msk.bf16.mxu0 %vm2617_vm1, %v2616_v2 }
  0x42   : > { %2279 = vmatprep.mubr.msk.bf16.mxu1 %vm2617_vm1, %v2616_v2 }
  0x48   : > { %2250 = vmatmul.mubr.msk.bf16.gmra.mrb[24].mxu0 %vm320_vm2, %v2891_v38 }
  0x49   : > { %2280 = vmatmul.mubr.msk.bf16.gmra.mrb[24].mxu1 %vm320_vm2, %v2839_v56  ;;  %2285 = vmatprep.mubr.msk.bf16.mxu0 %vm2617_vm1, %v2616_v2 }
  0x4a   : > { %2315 = vmatprep.mubr.msk.bf16.mxu1 %vm2617_vm1, %v2616_v2 }
  0x50   : > { %2286 = vmatmul.mubr.msk.bf16.vlgmr.msra.gmra.mrb[28].mxu0 %vm320_vm2, %v2744_v17  ;;  %v691_v17 = vsel %vm2843_vm5, %v686_v10, %v690_v46  ;;  %v742_v46 = vrot.slane %v740_v47, 4  ;;  %v2972_v10 = vcombine.low %v1291_v5, %v1294_v16  ;;  %v1299_v47 = vrot.slane %v1297_v36, 4 }
  0x51   : > { %2344 = vmatpush3.bf16.msra.mxu0 %v1029_v1  ;;  %2316 = vmatmul.mubr.msk.bf16.vlgmr.msra.gmra.mrb[28].mxu1 %vm320_vm2, %v2057_v9  ;;  %v2954_v58 = vcombine.low %v691_v17, %v701_v18  ;;  %v751_v1 = vshrl.u32 %v2771_v21, 16  ;;  %v764_v9 = vshrl.u32 %v2774_v22, 16  ;;  %v725_v21 = vsel %vm2843_vm5, %v720_v15, %v724_v51 }
  0x52   : > { %2289 = vmatprep.mubr.msk.bf16.mxu0 %vm2617_vm1, %v2616_v2  ;;  %2319 = vmatprep.mubr.msk.bf16.mxu1 %vm2617_vm1, %v2616_v2  ;;  %v743_v54 = vor.u32 %v742_v46, %v738_v60  ;;  %v2981_v37 = vcombine.low %v715_v13, %v725_v21  ;;  %v1298_v17 = vsel %vm2862_vm8, %v2094_v8, %v1297_v36  ;;  %v770_v51 = vshll.u32 %v269_v61, 16 }
  0x53   : > { %2374 = vmatpush3.bf16.msra.mxu1 %v1143_v39  ;;  %2403 = vmatprep.subr.bf16.mxu0 %v2616_v2  ;;  %v753_v34 = vrot.slane %v751_v1, 4  ;;  %v766_v40 = vrot.slane %v764_v9, 4  ;;  %v1301_v18 = vsel %vm2862_vm8, %v1299_v47, %v1300_v11  ;;  %v786_v61 = vrot.slane %v784_v59, 5 }
  0x54   : > { %2433 = vmatprep.subr.bf16.mxu1 %v2616_v2  ;;  %v744_v44 = vrot.slane %v743_v54, 4  ;;  %v3000_v52 = vcombine.low %v1298_v17, %v1301_v18  ;;  %v772_v46 = vrot.slane %v770_v51, 5  ;;  %v790_v1 = vrot.slane %v788_v45, 4  ;;  %v3046_v17 = vld [vmem:[%s2706_s11 + $0x60] sm:$0xf] }
  0x55   : > { %v812_v5 = vshrl.u32 %v2828_v43, 16  ;;  %v794_v16 = vshll.u32 %v272_v41, 16  ;;  %v782_v21 = vrot.slane %v781_v25, 4  ;;  %v3049_v18 = vld [vmem:[%s2706_s11 + $0x64] sm:$0xf] }
  0x56   : > { %v791_v9 = vor.u32 %v790_v1, %v786_v61 }
  0x57   : > { %v796_v54 = vrot.slane %v794_v16, 5 }
  0x58   : > { %2290 = vmatmul.mubr.msk.bf16.gmra.mrb[32].mxu0 %vm320_vm2, %v2762_v20  ;;  %v760_v20 = vshll.u32 %v2774_v22, 16  ;;  %v756_v22 = vrot.slane %v754_v6, 5 }
  0x59   : > { %2320 = vmatmul.mubr.msk.bf16.gmra.mrb[32].mxu1 %vm320_vm2, %v2954_v58  ;;  %2293 = vmatprep.mubr.msk.bf16.mxu0 %vm2617_vm1, %v2616_v2 }
  0x5a   : > { %2323 = vmatprep.mubr.msk.bf16.mxu1 %vm2617_vm1, %v2616_v2  ;;  %v762_v39 = vrot.slane %v760_v20, 5  ;;  %v757_v53 = vor.u32 %v756_v22, %v753_v34  ;;  %v808_v20 = vshll.u32 %v2828_v43, 16  ;;  %v804_v34 = vrot.slane %v802_v4, 5 }
  0x5b   : > { %v814_v22 = vrot.slane %v812_v5, 4 }
  0x5c   : > { %v767_v55 = vor.u32 %v766_v40, %v762_v39  ;;  %v758_v0 = vrot.slane %v757_v53, 4  ;;  %v810_v36 = vrot.slane %v808_v20, 5  ;;  %v3026_v40 = vld [vmem:[%s2706_s11 + $0x50] sm:$0x1]  ;;  %v2113_v53 = vld [vmem:[%s3528_s1 + $0xa] sm:$0x3] }
  0x5d   : > { %v1482_v59 = vsel %vm342_vm0, %v2113_v53, 0  ;;  %v2122_v20 = vld [vmem:[%s3528_s1 + $0x10] sm:$0x3]  ;;  %v1307_v27 = vrot.slane %v3026_v40, 5 }
  0x5e   : > { %v768_v60 = vrot.slane %v767_v55, 4  ;;  %v763_v6 = vsel %vm2843_vm5, %v758_v0, %v762_v39  ;;  %v787_v39 = vsel %vm2843_vm5, %v782_v21, %v786_v61  ;;  %v815_v8 = vor.u32 %v814_v22, %v810_v36  ;;  %v3109_v61 = vld [vmem:[%s2706_s11 + $0x68] sm:$0x1]  ;;  %s2524_s11 = smul.u32 28, %s3548_s19 }
  0x5f   : > { %v866_v4 = vshll.u32 %v3109_v61, 16  ;;  %v2096_v21 = vrot.slane %v2795_v26, 9 }
  0x60   : > { %2294 = vmatmul.mubr.msk.bf16.gmra.mrb[36].mxu0 %vm320_vm2, %v2780_v23  ;;  %v749_v23 = vsel %vm2843_vm5, %v744_v44, %v748_v31  ;;  %v792_v31 = vrot.slane %v791_v9, 4  ;;  %v805_v44 = vor.u32 %v804_v34, %v801_v29  ;;  %v816_v48 = vrot.slane %v815_v8, 4  ;;  %s246_s13 = sadd.s32 %s2524_s11, %s2020_s12 }
  0x61   : > { %2324 = vmatmul.mubr.msk.bf16.gmra.mrb[36].mxu1 %vm320_vm2, %v2981_v37  ;;  %2297 = vmatprep.mubr.msk.bf16.mxu0 %vm2617_vm1, %v2616_v2  ;;  %v3007_v15 = vcombine.low %v739_v24, %v749_v23  ;;  %v2098_v23 = vld [vmem:[%s3528_s1 + $0x4] sm:$0x3]  ;;  %v868_v16 = vrot.slane %v866_v4, 5  ;;  %v1314_v29 = vrot.slane %v2810_v32, 5  ;;  %s2021_s16 = sshll.u32 %s246_s13, 3 }
  0x62   : > { %2327 = vmatprep.mubr.msk.bf16.mxu1 %vm2617_vm1, %v2616_v2  ;;  %v797_v41 = vsel %vm2843_vm5, %v792_v31, %v796_v54  ;;  %v806_v11 = vrot.slane %v805_v44, 4  ;;  %v1368_v55 = vsel %vm342_vm0, %v2098_v23, 0  ;;  %s3470_s19 = scalar_lea.vmem %s3532_s5, %s2021_s16 }
  0x63   : > { %v2062_v47 = vcombine.low %v787_v39, %v797_v41 }
  0x64   : > { %v811_v45 = vsel %vm2843_vm5, %v806_v11, %v810_v36 }
  0x68   : > { %2298 = vmatmul.mubr.msk.bf16.gmra.mrb[40].mxu0 %vm320_vm2, %v2806_v30  ;;  %v773_v30 = vsel %vm2843_vm5, %v768_v60, %v772_v46  ;;  %v856_v46 = vshll.u32 %v3049_v18, 16 }
  0x69   : > { %2328 = vmatmul.mubr.msk.bf16.gmra.mrb[40].mxu1 %vm320_vm2, %v3007_v15  ;;  %2301 = vmatprep.mubr.msk.bf16.mxu0 %vm2617_vm1, %v2616_v2  ;;  %v2061_v13 = vcombine.low %v763_v6, %v773_v30 }
  0x6a   : > { %2331 = vmatprep.mubr.msk.bf16.mxu1 %vm2617_vm1, %v2616_v2  ;;  %v858_v0 = vrot.slane %v856_v46, 5 }
  0x70   : > { %2302 = vmatmul.mubr.msk.bf16.gmra.mrb[44].mxu0 %vm320_vm2, %v2839_v56  ;;  %v818_v56 = vshll.u32 %v3026_v40, 16 }
  0x71   : > { %2332 = vmatmul.mubr.msk.bf16.gmra.mrb[44].mxu1 %vm320_vm2, %v2061_v13  ;;  %2305 = vmatprep.mubr.msk.bf16.mxu0 %vm2617_vm1, %v2616_v2 }
  0x72   : > { %2335 = vmatprep.mubr.msk.bf16.mxu1 %vm2617_vm1, %v2616_v2  ;;  %v820_v49 = vrot.slane %v818_v56, 5 }
  0x74   : > { %v821_v24 = vsel %vm2843_vm5, %v816_v48, %v820_v49 }
  0x75   : > { %v2063_v51 = vcombine.low %v811_v45, %v821_v24 }
  0x78   : > { %2306 = vmatmul.mubr.msk.bf16.gmra.mrb[48].mxu0 %vm320_vm2, %v2891_v38  ;;  %v2048_v38 = vcombine.low %v3046_v17, %v3049_v18 }
  0x79   : > { %2336 = vmatmul.mubr.msk.bf16.gmra.mrb[48].mxu1 %vm320_vm2, %v2062_v47  ;;  %2309 = vmatprep.mubr.msk.bf16.mxu0 %vm2617_vm1, %v2616_v2 }
  0x7a   : > { %2339 = vmatprep.mubr.msk.bf16.mxu1 %vm2617_vm1, %v2616_v2 }
  0x80   : > { %2310 = vmatmul.mubr.msk.bf16.gmra.mrb[52].mxu0 %vm320_vm2, %v2048_v38 }
  0x81   : > { %2340 = vmatmul.mubr.msk.bf16.gmra.mrb[52].mxu1 %vm320_vm2, %v2063_v51  ;;  %2345 = vmatprep.mubr.msk.bf16.mxu0 %vm2617_vm1, %v2616_v2 }
  0x82   : > { %2375 = vmatprep.mubr.msk.bf16.mxu1 %vm2617_vm1, %v2616_v2 }
  0x88   : > { %2346 = vmatmul.mubr.msk.bf16.vlgmr.msra.gmra.mrb[56].mxu0 %vm320_vm2, %v2954_v58  ;;  %v847_v58 = vshrl.u32 %v3046_v17, 16 }
  0x89   : > { %2404 = vmatpush3.bf16.msra.mxu0 %v1368_v55  ;;  %2376 = vmatmul.mubr.msk.bf16.vlgmr.msra.gmra.mrb[56].mxu1 %vm320_vm2, %v2981_v37 }
  0x8a   : > { %2349 = vmatprep.mubr.msk.bf16.mxu0 %vm2617_vm1, %v2616_v2  ;;  %2379 = vmatprep.mubr.msk.bf16.mxu1 %vm2617_vm1, %v2616_v2  ;;  %v849_v63 = vrot.slane %v847_v58, 4 }
  0x8b   : > { %2434 = vmatpush3.bf16.msra.mxu1 %v1482_v59  ;;  %2463 = vmatprep.subr.bf16.mxu0 %v2616_v2 }
  0x8c   : > { %2493 = vmatprep.subr.bf16.mxu1 %v2616_v2 }
  0x90   : > { %2350 = vmatmul.mubr.msk.bf16.gmra.mrb[60].mxu0 %vm320_vm2, %v2981_v37  ;;  %v850_v37 = vshll.u32 %v3046_v17, 16 }
  0x91   : > { %2380 = vmatmul.mubr.msk.bf16.gmra.mrb[60].mxu1 %vm320_vm2, %v3007_v15  ;;  %2353 = vmatprep.mubr.msk.bf16.mxu0 %vm2617_vm1, %v2616_v2 }
  0x92   : > { %2383 = vmatprep.mubr.msk.bf16.mxu1 %vm2617_vm1, %v2616_v2  ;;  %v852_v19 = vrot.slane %v850_v37, 5 }
  0x94   : > { %v853_v1 = vor.u32 %v852_v19, %v849_v63 }
  0x96   : > { %v854_v5 = vrot.slane %v853_v1, 4 }
  0x98   : > { %2354 = vmatmul.mubr.msk.bf16.gmra.mrb[64].mxu0 %vm320_vm2, %v3007_v15  ;;  %v860_v15 = vshrl.u32 %v3049_v18, 16  ;;  %v859_v6 = vsel %vm2843_vm5, %v854_v5, %v858_v0 }
  0x99   : > { %2384 = vmatmul.mubr.msk.bf16.gmra.mrb[64].mxu1 %vm320_vm2, %v2061_v13  ;;  %2357 = vmatprep.mubr.msk.bf16.mxu0 %vm2617_vm1, %v2616_v2 }
  0x9a   : > { %2387 = vmatprep.mubr.msk.bf16.mxu1 %vm2617_vm1, %v2616_v2  ;;  %v862_v60 = vrot.slane %v860_v15, 4 }
  0x9c   : > { %v863_v3 = vor.u32 %v862_v60, %v858_v0 }
  0x9e   : > { %v864_v25 = vrot.slane %v863_v3, 4 }
  0xa0   : > { %2358 = vmatmul.mubr.msk.bf16.gmra.mrb[68].mxu0 %vm320_vm2, %v2061_v13  ;;  %v869_v30 = vsel %vm2843_vm5, %v864_v25, %v868_v16  ;;  %v1596_v13 = vsel %vm342_vm0, %v2122_v20, 0 }
  0xa1   : > { %2388 = vmatmul.mubr.msk.bf16.gmra.mrb[68].mxu1 %vm320_vm2, %v2062_v47  ;;  %2361 = vmatprep.mubr.msk.bf16.mxu0 %vm2617_vm1, %v2616_v2  ;;  %v2081_v9 = vcombine.low %v859_v6, %v869_v30 }
  0xa2   : > { %2391 = vmatprep.mubr.msk.bf16.mxu1 %vm2617_vm1, %v2616_v2 }
  0xa8   : > { %2362 = vmatmul.mubr.msk.bf16.gmra.mrb[72].mxu0 %vm320_vm2, %v2062_v47 }
  0xa9   : > { %2392 = vmatmul.mubr.msk.bf16.gmra.mrb[72].mxu1 %vm320_vm2, %v2063_v51  ;;  %2365 = vmatprep.mubr.msk.bf16.mxu0 %vm2617_vm1, %v2616_v2 }
  0xaa   : > { %2395 = vmatprep.mubr.msk.bf16.mxu1 %vm2617_vm1, %v2616_v2 }
  0xb0   : > { %2366 = vmatmul.mubr.msk.bf16.gmra.mrb[76].mxu0 %vm320_vm2, %v2063_v51 }
  0xb1   : > { %2396 = vmatmul.mubr.msk.bf16.gmra.mrb[76].mxu1 %vm320_vm2, %v2860_v12  ;;  %2369 = vmatprep.mubr.msk.bf16.mxu0 %vm2617_vm1, %v2616_v2 }
  0xb2   : > { %2399 = vmatprep.mubr.msk.bf16.mxu1 %vm2617_vm1, %v2616_v2 }
  0xb8   : > { %2370 = vmatmul.mubr.msk.bf16.gmra.mrb[80].mxu0 %vm320_vm2, %v2860_v12  ;;  %v2095_v12 = vrot.slane %v2825_v42, 9  ;;  %v1308_v42 = vsel %vm2862_vm8, %v1306_v14, %v1307_v27 }
  0xb9   : > { %2400 = vmatmul.mubr.msk.bf16.gmra.mrb[80].mxu1 %vm320_vm2, %v2081_v9  ;;  %2405 = vmatprep.mubr.msk.bf16.mxu0 %vm2617_vm1, %v2616_v2 }
  0xba   : > { %2435 = vmatprep.mubr.msk.bf16.mxu1 %vm2617_vm1, %v2616_v2  ;;  %v1305_v43 = vsel %vm2862_vm8, %v2095_v12, %v1304_v57 }
  0xc0   : > { %2406 = vmatmul.mubr.msk.bf16.vlgmr.msra.gmra.mrb[84].mxu0 %vm320_vm2, %v2099_v33  ;;  %v1311_v33 = vrot.slane %v2801_v28, 5 }
  0xc1   : > { %2464 = vmatpush3.bf16.msra.mxu0 %v1596_v13  ;;  %2436 = vmatmul.mubr.msk.bf16.vlgmr.msra.gmra.mrb[84].mxu1 %vm320_vm2, %v2887_v35 }
  0xc2   : > { %2409 = vmatprep.mubr.msk.bf16.mxu0 %vm2617_vm1, %v2616_v2  ;;  %2439 = vmatprep.mubr.msk.bf16.mxu1 %vm2617_vm1, %v2616_v2  ;;  %v1313_v54 = vrot.slane %v1311_v33, 4  ;;  %v1312_v28 = vsel %vm2862_vm8, %v2096_v21, %v1311_v33 }
  0xc4   : > { %v1315_v26 = vsel %vm2862_vm8, %v1313_v54, %v1314_v29 }
  0xc5   : > { %v3208_v39 = vcombine.low %v1312_v28, %v1315_v26 }
  0xc8   : > { %2410 = vmatmul.mubr.msk.bf16.gmra.mrb[88].mxu0 %vm320_vm2, %v2887_v35  ;;  %v3190_v35 = vcombine.low %v1305_v43, %v1308_v42 }
  0xc9   : > { %2440 = vmatmul.mubr.msk.bf16.gmra.mrb[88].mxu1 %vm320_vm2, %v2913_v62  ;;  %2413 = vmatprep.mubr.msk.bf16.mxu0 %vm2617_vm1, %v2616_v2 }
  0xca   : > { %2443 = vmatprep.mubr.msk.bf16.mxu1 %vm2617_vm1, %v2616_v2 }
  0xd0   : > { %2414 = vmatmul.mubr.msk.bf16.gmra.mrb[92].mxu0 %vm320_vm2, %v2913_v62 }
  0xd1   : > { %2444 = vmatmul.mubr.msk.bf16.gmra.mrb[92].mxu1 %vm320_vm2, %v2940_v50  ;;  %2417 = vmatprep.mubr.msk.bf16.mxu0 %vm2617_vm1, %v2616_v2 }
  0xd2   : > { %2447 = vmatprep.mubr.msk.bf16.mxu1 %vm2617_vm1, %v2616_v2 }
  0xd8   : > { %2418 = vmatmul.mubr.msk.bf16.gmra.mrb[96].mxu0 %vm320_vm2, %v2940_v50 }
  0xd9   : > { %2448 = vmatmul.mubr.msk.bf16.gmra.mrb[96].mxu1 %vm320_vm2, %v2972_v10  ;;  %2421 = vmatprep.mubr.msk.bf16.mxu0 %vm2617_vm1, %v2616_v2 }
  0xda   : > { %2451 = vmatprep.mubr.msk.bf16.mxu1 %vm2617_vm1, %v2616_v2 }
  0xe0   : > { %2422 = vmatmul.mubr.msk.bf16.gmra.mrb[100].mxu0 %vm320_vm2, %v2972_v10 }
  0xe1   : > { %2452 = vmatmul.mubr.msk.bf16.gmra.mrb[100].mxu1 %vm320_vm2, %v3000_v52  ;;  %2425 = vmatprep.mubr.msk.bf16.mxu0 %vm2617_vm1, %v2616_v2 }
  0xe2   : > { %2455 = vmatprep.mubr.msk.bf16.mxu1 %vm2617_vm1, %v2616_v2 }
  0xe8   : > { %2426 = vmatmul.mubr.msk.bf16.gmra.mrb[104].mxu0 %vm320_vm2, %v3000_v52 }
  0xe9   : > { %2456 = vmatmul.mubr.msk.bf16.gmra.mrb[104].mxu1 %vm320_vm2, %v3190_v35  ;;  %2429 = vmatprep.mubr.msk.bf16.mxu0 %vm2617_vm1, %v2616_v2 }
  0xea   : > { %2459 = vmatprep.mubr.msk.bf16.mxu1 %vm2617_vm1, %v2616_v2 }
  0xeb   : > { %v380_v31 = vpop.f32.mrb[0].mxu0 }
  0xec   : > { %v480_v32 = vpop.f32.mrb[0].mxu1  ;;  %v2227_v34 = vpop.f32.mrb[1].mxu0 }
  0xed   : > { %v3206_v36 = vadd.f32 %v480_v32, %v380_v31  ;;  %v2257_v22 = vpop.f32.mrb[1].mxu1  ;;  %v383_v40 = vpop.f32.mrb[2].mxu0 }
  0xee   : > { %v483_v41 = vpop.f32.mrb[2].mxu1  ;;  %v2228_v44 = vpop.f32.mrb[3].mxu0 }
  0xef   : > { %v3210_v8 = vadd.f32 %v483_v41, %v383_v40  ;;  %v2258_v56 = vpop.f32.mrb[3].mxu1 }
  0xf0   : > { %2430 = vmatmul.mubr.msk.bf16.gmra.mrb[108].mxu0 %vm320_vm2, %v3190_v35 }
  0xf1   : > { %2460 = vmatmul.mubr.msk.bf16.gmra.mrb[108].mxu1 %vm320_vm2, %v3208_v39  ;;  %2465 = vmatprep.mubr.msk.bf16.mxu0 %vm2617_vm1, %v2616_v2 }
  0xf2   : > { %2495 = vmatprep.mubr.msk.bf16.mxu1 %vm2617_vm1, %v2616_v2 }
  0xf3   : > { %v388_v47 = vpop.f32.mrb[4].mxu0 }
  0xf4   : > { %v488_v11 = vpop.f32.mrb[4].mxu1  ;;  %v2231_v48 = vpop.f32.mrb[5].mxu0 }
  0xf5   : > { %v3220_v49 = vadd.f32 %v488_v11, %v388_v47  ;;  %v2261_v45 = vpop.f32.mrb[5].mxu1  ;;  %v391_v24 = vpop.f32.mrb[6].mxu0  ;;  %v2097_v48 = vrot.slane %v3046_v17, 9 }
  0xf6   : > { %v491_v38 = vpop.f32.mrb[6].mxu1  ;;  %v2232_v51 = vpop.f32.mrb[7].mxu0 }
  0xf7   : > { %v3222_v23 = vadd.f32 %v491_v38, %v391_v24  ;;  %v2262_v53 = vpop.f32.mrb[7].mxu1  ;;  %v1321_v24 = vrot.slane %v3109_v61, 5 }
  0xf8   : > { %2466 = vmatmul.mubr.msk.bf16.vlgmr.msra.gmra.mrb[112].mxu0 %vm320_vm2, %v2913_v62 }
  0xf9   : > { %2469 = vmatprep.mubr.msk.bf16.mxu0 %vm2617_vm1, %v2616_v2 }
  0xfb   : > { %v396_v55 = vpop.f32.mrb[8].mxu0 }
  0xfc   : > { %v496_v59 = vpop.f32.mrb[8].mxu1  ;;  %v2235_v58 = vpop.f32.mrb[9].mxu0 }
  0xfd   : > { %v3228_v37 = vadd.f32 %v496_v59, %v396_v55  ;;  %v2265_v15 = vpop.f32.mrb[9].mxu1  ;;  %v399_v46 = vpop.f32.mrb[10].mxu0 }
  0xfe   : > { %v499_v63 = vpop.f32.mrb[10].mxu1  ;;  %v2236_v19 = vpop.f32.mrb[11].mxu0 }
  0xff   : > { %v3230_v0 = vadd.f32 %v499_v63, %v399_v46  ;;  %v2266_v60 = vpop.f32.mrb[11].mxu1 }
 0x100   : > { %2470 = vmatmul.mubr.msk.bf16.gmra.mrb[116].mxu0 %vm320_vm2, %v2940_v50 }
 0x101   : > { %2473 = vmatprep.mubr.msk.bf16.mxu0 %vm2617_vm1, %v2616_v2 }
 0x103   : > { %v404_v62 = vpop.f32.mrb[12].mxu0 }
 0x104   : > { %v504_v1 = vpop.f32.mrb[12].mxu1  ;;  %v2239_v3 = vpop.f32.mrb[13].mxu0 }
 0x105   : > { %v3236_v4 = vadd.f32 %v504_v1, %v404_v62  ;;  %v2269_v5 = vpop.f32.mrb[13].mxu1  ;;  %v407_v25 = vpop.f32.mrb[14].mxu0 }
 0x106   : > { %v507_v16 = vpop.f32.mrb[14].mxu1  ;;  %v2240_v6 = vpop.f32.mrb[15].mxu0 }
 0x107   : > { %v3238_v30 = vadd.f32 %v507_v16, %v407_v25  ;;  %v2270_v9 = vpop.f32.mrb[15].mxu1 }
 0x108   : > { %2474 = vmatmul.mubr.msk.bf16.gmra.mrb[120].mxu0 %vm320_vm2, %v2972_v10 }
 0x109   : > { %2477 = vmatprep.mubr.msk.bf16.mxu0 %vm2617_vm1, %v2616_v2 }
 0x10b   : > { %v412_v50 = vpop.f32.mrb[16].mxu0 }
 0x10c   : > { %v512_v20 = vpop.f32.mrb[16].mxu1  ;;  %v2243_v13 = vpop.f32.mrb[17].mxu0 }
 0x10d   : > { %v3244_v57 = vadd.f32 %v512_v20, %v412_v50  ;;  %v2273_v12 = vpop.f32.mrb[17].mxu1  ;;  %v415_v14 = vpop.f32.mrb[18].mxu0 }
 0x10e   : > { %v515_v27 = vpop.f32.mrb[18].mxu1  ;;  %v2244_v43 = vpop.f32.mrb[19].mxu0 }
 0x10f   : > { %v3246_v42 = vadd.f32 %v515_v27, %v415_v14  ;;  %v2274_v33 = vpop.f32.mrb[19].mxu1 }
 0x110   : > { %2478 = vmatmul.mubr.msk.bf16.gmra.mrb[124].mxu0 %vm320_vm2, %v3000_v52  ;;  %v1318_v52 = vrot.slane %v3049_v18, 5  ;;  %v1757_v18 = vld [vmem:[%s3530_s3] sm:$0x3] }
 0x111   : > { %2481 = vmatprep.mubr.msk.bf16.mxu0 %vm2617_vm1, %v2616_v2  ;;  %v1787_v55 = vsel %vm342_vm0, %v1757_v18, 0 }
 0x112   : > { %v1320_v45 = vrot.slane %v1318_v52, 4  ;;  %v1319_v17 = vsel %vm2862_vm8, %v2097_v48, %v1318_v52  ;;  %2494 = vmatpush3.bf16.msra.mxu1 %v1787_v55 }
 0x113   : > { %v420_v10 = vpop.f32.mrb[20].mxu0 }
 0x114   : > { %v520_v21 = vpop.f32.mrb[20].mxu1  ;;  %v2247_v54 = vpop.f32.mrb[21].mxu0  ;;  %v1322_v61 = vsel %vm2862_vm8, %v1320_v45, %v1321_v24 }
 0x115   : > { %v3252_v29 = vadd.f32 %v520_v21, %v420_v10  ;;  %v2277_v28 = vpop.f32.mrb[21].mxu1  ;;  %v423_v26 = vpop.f32.mrb[22].mxu0  ;;  %v2123_v46 = vcombine.low %v1319_v17, %v1322_v61 }
 0x116   : > { %v523_v31 = vpop.f32.mrb[22].mxu1  ;;  %v2248_v32 = vpop.f32.mrb[23].mxu0 }
 0x117   : > { %v3254_v34 = vadd.f32 %v523_v31, %v423_v26  ;;  %v2278_v22 = vpop.f32.mrb[23].mxu1 }
 0x118   : > { %2482 = vmatmul.mubr.msk.bf16.gmra.mrb[128].mxu0 %vm320_vm2, %v3190_v35 }
 0x119   : > { %2485 = vmatprep.mubr.msk.bf16.mxu0 %vm2617_vm1, %v2616_v2 }
 0x11b   : > { %v428_v40 = vpop.f32.mrb[24].mxu0 }
 0x11c   : > { %v528_v41 = vpop.f32.mrb[24].mxu1  ;;  %v2251_v44 = vpop.f32.mrb[25].mxu0 }
 0x11d   : > { %v3261_v56 = vadd.f32 %v528_v41, %v428_v40  ;;  %v2281_v47 = vpop.f32.mrb[25].mxu1  ;;  %v431_v11 = vpop.f32.mrb[26].mxu0 }
 0x11e   : > { %v531_v38 = vpop.f32.mrb[26].mxu1  ;;  %v2252_v51 = vpop.f32.mrb[27].mxu0 }
 0x11f   : > { %v3265_v35 = vadd.f32 %v531_v38, %v431_v11  ;;  %v2282_v53 = vpop.f32.mrb[27].mxu1 }
 0x120   : > { %2486 = vmatmul.mubr.msk.bf16.gmra.mrb[132].mxu0 %vm320_vm2, %v3208_v39 }
 0x121   : > { %2489 = vmatprep.mubr.msk.bf16.mxu0 %vm2617_vm1, %v2616_v2 }
 0x123   : > { %v582_v59 = vpop.f32.mrb[28].mxu0 }
 0x124   : > { %v637_v58 = vadd.f32 %v582_v59, %v3206_v36  ;;  %v2287_v39 = vpop.f32.mrb[29].mxu0  ;;  %v951_v15 = vpop.f32.mrb[28].mxu1 }
 0x125   : > { %v585_v63 = vpop.f32.mrb[30].mxu0  ;;  %v2317_v19 = vpop.f32.mrb[29].mxu1 }
 0x126   : > { %v638_v60 = vadd.f32 %v585_v63, %v3210_v8  ;;  %v3281_v62 = vadd.f32 %v951_v15, %v637_v58  ;;  %v2288_v1 = vpop.f32.mrb[31].mxu0  ;;  %v954_v3 = vpop.f32.mrb[30].mxu1 }
 0x127   : > { %v2318_v5 = vpop.f32.mrb[31].mxu1 }
 0x128   : > { %v3283_v7 = vadd.f32 %v954_v3, %v638_v60  ;;  %2490 = vmatmul.mubr.msk.bf16.gmra.mrb[136].mxu0 %vm320_vm2, %v2123_v46 }
 0x12b   : > { %v590_v25 = vpop.f32.mrb[32].mxu0 }
 0x12c   : > { %v639_v16 = vadd.f32 %v590_v25, %v3220_v49  ;;  %v2291_v36 = vpop.f32.mrb[33].mxu0  ;;  %v959_v6 = vpop.f32.mrb[32].mxu1 }
 0x12d   : > { %v593_v9 = vpop.f32.mrb[34].mxu0  ;;  %v2321_v50 = vpop.f32.mrb[33].mxu1 }
 0x12e   : > { %v640_v20 = vadd.f32 %v593_v9, %v3222_v23  ;;  %v3288_v13 = vadd.f32 %v959_v6, %v639_v16  ;;  %v2292_v8 = vpop.f32.mrb[35].mxu0  ;;  %v962_v12 = vpop.f32.mrb[34].mxu1 }
 0x12f   : > { %v2322_v14 = vpop.f32.mrb[35].mxu1 }
 0x130   : > { %v3290_v27 = vadd.f32 %v962_v12, %v640_v20 }
 0x133   : > { %v598_v43 = vpop.f32.mrb[36].mxu0 }
 0x134   : > { %v641_v33 = vadd.f32 %v598_v43, %v3228_v37  ;;  %v2295_v10 = vpop.f32.mrb[37].mxu0  ;;  %v967_v21 = vpop.f32.mrb[36].mxu1 }
 0x135   : > { %v601_v54 = vpop.f32.mrb[38].mxu0  ;;  %v2325_v49 = vpop.f32.mrb[37].mxu1 }
 0x136   : > { %v642_v28 = vadd.f32 %v601_v54, %v3230_v0  ;;  %v3294_v26 = vadd.f32 %v967_v21, %v641_v33  ;;  %v2296_v31 = vpop.f32.mrb[39].mxu0  ;;  %v970_v23 = vpop.f32.mrb[38].mxu1 }
 0x137   : > { %v2326_v32 = vpop.f32.mrb[39].mxu1 }
 0x138   : > { %v3296_v22 = vadd.f32 %v970_v23, %v642_v28 }
 0x13b   : > { %v606_v52 = vpop.f32.mrb[40].mxu0 }
 0x13c   : > { %v643_v40 = vadd.f32 %v606_v52, %v3236_v4  ;;  %v2299_v41 = vpop.f32.mrb[41].mxu0  ;;  %v975_v44 = vpop.f32.mrb[40].mxu1 }
 0x13d   : > { %v609_v47 = vpop.f32.mrb[42].mxu0  ;;  %v2329_v37 = vpop.f32.mrb[41].mxu1 }
 0x13e   : > { %v644_v11 = vadd.f32 %v609_v47, %v3238_v30  ;;  %v3300_v48 = vadd.f32 %v975_v44, %v643_v40  ;;  %v2300_v45 = vpop.f32.mrb[43].mxu0  ;;  %v978_v0 = vpop.f32.mrb[42].mxu1 }
 0x13f   : > { %v2330_v24 = vpop.f32.mrb[43].mxu1 }
 0x140   : > { %v3302_v38 = vadd.f32 %v978_v0, %v644_v11 }
 0x143   : > { %v614_v51 = vpop.f32.mrb[44].mxu0 }
 0x144   : > { %v645_v53 = vadd.f32 %v614_v51, %v3244_v57  ;;  %v2303_v18 = vpop.f32.mrb[45].mxu0  ;;  %v983_v17 = vpop.f32.mrb[44].mxu1 }
 0x145   : > { %v617_v61 = vpop.f32.mrb[46].mxu0  ;;  %v2333_v4 = vpop.f32.mrb[45].mxu1 }
 0x146   : > { %v646_v55 = vadd.f32 %v617_v61, %v3246_v42  ;;  %v3306_v59 = vadd.f32 %v983_v17, %v645_v53  ;;  %v2304_v58 = vpop.f32.mrb[47].mxu0  ;;  %v986_v30 = vpop.f32.mrb[46].mxu1 }
 0x147   : > { %v2334_v39 = vpop.f32.mrb[47].mxu1 }
 0x148   : > { %v3308_v15 = vadd.f32 %v986_v30, %v646_v55 }
 0x14b   : > { %v622_v46 = vpop.f32.mrb[48].mxu0 }
 0x14c   : > { %v647_v63 = vadd.f32 %v622_v46, %v3252_v29  ;;  %v2307_v19 = vpop.f32.mrb[49].mxu0  ;;  %v991_v60 = vpop.f32.mrb[48].mxu1 }
 0x14d   : > { %v625_v1 = vpop.f32.mrb[50].mxu0  ;;  %v2337_v57 = vpop.f32.mrb[49].mxu1 }
 0x14e   : > { %v648_v3 = vadd.f32 %v625_v1, %v3254_v34  ;;  %v3312_v5 = vadd.f32 %v991_v60, %v647_v63  ;;  %v2308_v25 = vpop.f32.mrb[51].mxu0  ;;  %v994_v42 = vpop.f32.mrb[50].mxu1 }
 0x14f   : > { %v2338_v16 = vpop.f32.mrb[51].mxu1 }
 0x150   : > { %v3314_v36 = vadd.f32 %v994_v42, %v648_v3 }
 0x153   : > { %v630_v6 = vpop.f32.mrb[52].mxu0 }
 0x154   : > { %v649_v9 = vadd.f32 %v630_v6, %v3261_v56  ;;  %v2311_v50 = vpop.f32.mrb[53].mxu0  ;;  %v999_v20 = vpop.f32.mrb[52].mxu1 }
 0x155   : > { %v633_v8 = vpop.f32.mrb[54].mxu0  ;;  %v2341_v29 = vpop.f32.mrb[53].mxu1 }
 0x156   : > { %v650_v12 = vadd.f32 %v633_v8, %v3265_v35  ;;  %v3318_v14 = vadd.f32 %v999_v20, %v649_v9  ;;  %v2312_v43 = vpop.f32.mrb[55].mxu0  ;;  %v1002_v34 = vpop.f32.mrb[54].mxu1 }
 0x157   : > { %v2342_v33 = vpop.f32.mrb[55].mxu1 }
 0x158   : > { %v3320_v10 = vadd.f32 %v1002_v34, %v650_v12 }
 0x15b   : > { %v1065_v21 = vpop.f32.mrb[56].mxu0 }
 0x15c   : > { %v1120_v54 = vadd.f32 %v1065_v21, %v3281_v62  ;;  %v2347_v49 = vpop.f32.mrb[57].mxu0  ;;  %v1179_v28 = vpop.f32.mrb[56].mxu1 }
 0x15d   : > { %v1068_v31 = vpop.f32.mrb[58].mxu0  ;;  %v2377_v56 = vpop.f32.mrb[57].mxu1 }
 0x15e   : > { %v1121_v23 = vadd.f32 %v1068_v31, %v3283_v7  ;;  %v3324_v32 = vadd.f32 %v1179_v28, %v1120_v54  ;;  %v2348_v52 = vpop.f32.mrb[59].mxu0  ;;  %v1182_v35 = vpop.f32.mrb[58].mxu1 }
 0x15f   : > { %v2378_v40 = vpop.f32.mrb[59].mxu1 }
 0x160   : > { %v3326_v41 = vadd.f32 %v1182_v35, %v1121_v23 }
 0x163   : > { %v1073_v44 = vpop.f32.mrb[60].mxu0 }
 0x164   : > { %v1122_v47 = vadd.f32 %v1073_v44, %v3288_v13  ;;  %v2351_v37 = vpop.f32.mrb[61].mxu0  ;;  %v1187_v11 = vpop.f32.mrb[60].mxu1 }
 0x165   : > { %v1076_v45 = vpop.f32.mrb[62].mxu0  ;;  %v2381_v62 = vpop.f32.mrb[61].mxu1 }
 0x166   : > { %v1123_v0 = vadd.f32 %v1076_v45, %v3290_v27  ;;  %v3330_v24 = vadd.f32 %v1187_v11, %v1122_v47  ;;  %v2352_v51 = vpop.f32.mrb[63].mxu0  ;;  %v1190_v7 = vpop.f32.mrb[62].mxu1 }
 0x167   : > { %v2382_v53 = vpop.f32.mrb[63].mxu1 }
 0x168   : > { %v3332_v18 = vadd.f32 %v1190_v7, %v1123_v0 }
 0x16b   : > { %v1081_v17 = vpop.f32.mrb[64].mxu0 }
 0x16c   : > { %v1124_v61 = vadd.f32 %v1081_v17, %v3294_v26  ;;  %v2355_v4 = vpop.f32.mrb[65].mxu0  ;;  %v1195_v55 = vpop.f32.mrb[64].mxu1 }
 0x16d   : > { %v1084_v58 = vpop.f32.mrb[66].mxu0  ;;  %v2385_v13 = vpop.f32.mrb[65].mxu1 }
 0x16e   : > { %v1125_v30 = vadd.f32 %v1084_v58, %v3296_v22  ;;  %v3336_v39 = vadd.f32 %v1195_v55, %v1124_v61  ;;  %v2356_v46 = vpop.f32.mrb[67].mxu0  ;;  %v1198_v27 = vpop.f32.mrb[66].mxu1 }
 0x16f   : > { %v2386_v63 = vpop.f32.mrb[67].mxu1 }
 0x170   : > { %v3338_v19 = vadd.f32 %v1198_v27, %v1125_v30 }
 0x173   : > { %v1089_v60 = vpop.f32.mrb[68].mxu0 }
 0x174   : > { %v1126_v1 = vadd.f32 %v1089_v60, %v3300_v48  ;;  %v2359_v57 = vpop.f32.mrb[69].mxu0  ;;  %v1203_v3 = vpop.f32.mrb[68].mxu1 }
 0x175   : > { %v1092_v25 = vpop.f32.mrb[70].mxu0  ;;  %v2389_v26 = vpop.f32.mrb[69].mxu1 }
 0x176   : > { %v1127_v42 = vadd.f32 %v1092_v25, %v3302_v38  ;;  %v3342_v16 = vadd.f32 %v1203_v3, %v1126_v1  ;;  %v2360_v6 = vpop.f32.mrb[71].mxu0  ;;  %v1206_v22 = vpop.f32.mrb[70].mxu1 }
 0x177   : > { %v2390_v9 = vpop.f32.mrb[71].mxu1 }
 0x178   : > { %v3344_v50 = vadd.f32 %v1206_v22, %v1127_v42 }
 0x17b   : > { %v1097_v20 = vpop.f32.mrb[72].mxu0 }
 0x17c   : > { %v1128_v8 = vadd.f32 %v1097_v20, %v3306_v59  ;;  %v2363_v29 = vpop.f32.mrb[73].mxu0  ;;  %v1211_v12 = vpop.f32.mrb[72].mxu1 }
 0x17d   : > { %v1100_v43 = vpop.f32.mrb[74].mxu0  ;;  %v2393_v48 = vpop.f32.mrb[73].mxu1 }
 0x17e   : > { %v1129_v34 = vadd.f32 %v1100_v43, %v3308_v15  ;;  %v3348_v33 = vadd.f32 %v1211_v12, %v1128_v8  ;;  %v2364_v21 = vpop.f32.mrb[75].mxu0  ;;  %v1214_v38 = vpop.f32.mrb[74].mxu1 }
 0x17f   : > { %v2394_v54 = vpop.f32.mrb[75].mxu1 }
 0x180   : > { %v3350_v49 = vadd.f32 %v1214_v38, %v1129_v34 }
 0x183   : > { %v1105_v28 = vpop.f32.mrb[76].mxu0 }
 0x184   : > { %v1130_v31 = vadd.f32 %v1105_v28, %v3312_v5  ;;  %v2367_v56 = vpop.f32.mrb[77].mxu0  ;;  %v1219_v23 = vpop.f32.mrb[76].mxu1 }
 0x185   : > { %v1108_v52 = vpop.f32.mrb[78].mxu0  ;;  %v2397_v59 = vpop.f32.mrb[77].mxu1 }
 0x186   : > { %v1131_v35 = vadd.f32 %v1108_v52, %v3314_v36  ;;  %v3354_v40 = vadd.f32 %v1219_v23, %v1130_v31  ;;  %v2368_v44 = vpop.f32.mrb[79].mxu0  ;;  %v1222_v15 = vpop.f32.mrb[78].mxu1 }
 0x187   : > { %v2398_v47 = vpop.f32.mrb[79].mxu1 }
 0x188   : > { %v3356_v37 = vadd.f32 %v1222_v15, %v1131_v35 }
 0x18b   : > { %v1113_v11 = vpop.f32.mrb[80].mxu0 }
 0x18c   : > { %v1132_v45 = vadd.f32 %v1113_v11, %v3318_v14  ;;  %v2371_v62 = vpop.f32.mrb[81].mxu0  ;;  %v1227_v0 = vpop.f32.mrb[80].mxu1 }
 0x18d   : > { %v1116_v51 = vpop.f32.mrb[82].mxu0  ;;  %v2401_v5 = vpop.f32.mrb[81].mxu1 }
 0x18e   : > { %v1133_v7 = vadd.f32 %v1116_v51, %v3320_v10  ;;  %v3360_v53 = vadd.f32 %v1227_v0, %v1132_v45  ;;  %v2372_v17 = vpop.f32.mrb[83].mxu0  ;;  %v1230_v36 = vpop.f32.mrb[82].mxu1 }
 0x18f   : > { %v2402_v61 = vpop.f32.mrb[83].mxu1 }
 0x190   : > { %v3362_v4 = vadd.f32 %v1230_v36, %v1133_v7 }
 0x193   : > { %v1404_v55 = vpop.f32.mrb[84].mxu0 }
 0x194   : > { %v1459_v58 = vadd.f32 %v1404_v55, %v3324_v32  ;;  %v2407_v13 = vpop.f32.mrb[85].mxu0  ;;  %v1518_v30 = vpop.f32.mrb[84].mxu1 }
 0x195   : > { %v1407_v46 = vpop.f32.mrb[86].mxu0  ;;  %v2437_v14 = vpop.f32.mrb[85].mxu1 }
 0x196   : > { %v1460_v27 = vadd.f32 %v1407_v46, %v3326_v41  ;;  %v3366_v63 = vadd.f32 %v1518_v30, %v1459_v58  ;;  %v2408_v60 = vpop.f32.mrb[87].mxu0  ;;  %v1521_v10 = vpop.f32.mrb[86].mxu1 }
 0x197   : > { %v2438_v1 = vpop.f32.mrb[87].mxu1 }
 0x198   : > { %v3368_v57 = vadd.f32 %v1521_v10, %v1460_v27 }
 0x19b   : > { %v1412_v3 = vpop.f32.mrb[88].mxu0 }
 0x19c   : > { %v1461_v25 = vadd.f32 %v1412_v3, %v3330_v24  ;;  %v2411_v26 = vpop.f32.mrb[89].mxu0  ;;  %v1526_v42 = vpop.f32.mrb[88].mxu1 }
 0x19d   : > { %v1415_v6 = vpop.f32.mrb[90].mxu0  ;;  %v2441_v32 = vpop.f32.mrb[89].mxu1 }
 0x19e   : > { %v1462_v22 = vadd.f32 %v1415_v6, %v3332_v18  ;;  %v3372_v9 = vadd.f32 %v1526_v42, %v1461_v25  ;;  %v2412_v20 = vpop.f32.mrb[91].mxu0  ;;  %v1529_v41 = vpop.f32.mrb[90].mxu1 }
 0x19f   : > { %v2442_v8 = vpop.f32.mrb[91].mxu1 }
 0x1a0   : > { %v3374_v29 = vadd.f32 %v1529_v41, %v1462_v22 }
 0x1a3   : > { %v1420_v12 = vpop.f32.mrb[92].mxu0 }
 0x1a4   : > { %v1463_v43 = vadd.f32 %v1420_v12, %v3336_v39  ;;  %v2415_v48 = vpop.f32.mrb[93].mxu0  ;;  %v1534_v34 = vpop.f32.mrb[92].mxu1 }
 0x1a5   : > { %v1423_v21 = vpop.f32.mrb[94].mxu0  ;;  %v2445_v24 = vpop.f32.mrb[93].mxu1 }
 0x1a6   : > { %v1464_v38 = vadd.f32 %v1423_v21, %v3338_v19  ;;  %v3378_v54 = vadd.f32 %v1534_v34, %v1463_v43  ;;  %v2416_v28 = vpop.f32.mrb[95].mxu0  ;;  %v1537_v18 = vpop.f32.mrb[94].mxu1  ;;  %v3409_v21 = vld [vmem:[%s3529_s2] ss:$0 sm:$0xff] }
 0x1a7   : > { %v2446_v31 = vpop.f32.mrb[95].mxu1 }
 0x1a8   : > { %v3380_v56 = vadd.f32 %v1537_v18, %v1464_v38 }
 0x1ab   : > { %v1428_v23 = vpop.f32.mrb[96].mxu0 }
 0x1ac   : > { %v1465_v52 = vadd.f32 %v1428_v23, %v3342_v16  ;;  %v2419_v59 = vpop.f32.mrb[97].mxu0  ;;  %v1542_v35 = vpop.f32.mrb[96].mxu1 }
 0x1ad   : > { %v1431_v44 = vpop.f32.mrb[98].mxu0  ;;  %v2449_v39 = vpop.f32.mrb[97].mxu1 }
 0x1ae   : > { %v1466_v15 = vadd.f32 %v1431_v44, %v3344_v50  ;;  %v3384_v47 = vadd.f32 %v1542_v35, %v1465_v52  ;;  %v2420_v11 = vpop.f32.mrb[99].mxu0  ;;  %v1545_v19 = vpop.f32.mrb[98].mxu1 }
 0x1af   : > { %v2450_v45 = vpop.f32.mrb[99].mxu1 }
 0x1b0   : > { %v3386_v62 = vadd.f32 %v1545_v19, %v1466_v15 }
 0x1b3   : > { %v1436_v0 = vpop.f32.mrb[100].mxu0 }
 0x1b4   : > { %v1467_v51 = vadd.f32 %v1436_v0, %v3348_v33  ;;  %v2423_v5 = vpop.f32.mrb[101].mxu0  ;;  %v1550_v7 = vpop.f32.mrb[100].mxu1 }
 0x1b5   : > { %v1439_v17 = vpop.f32.mrb[102].mxu0  ;;  %v2453_v16 = vpop.f32.mrb[101].mxu1 }
 0x1b6   : > { %v1468_v36 = vadd.f32 %v1439_v17, %v3350_v49  ;;  %v3390_v61 = vadd.f32 %v1550_v7, %v1467_v51  ;;  %v2424_v55 = vpop.f32.mrb[103].mxu0  ;;  %v1553_v50 = vpop.f32.mrb[102].mxu1 }
 0x1b7   : > { %v2454_v58 = vpop.f32.mrb[103].mxu1 }
 0x1b8   : > { %v3392_v13 = vadd.f32 %v1553_v50, %v1468_v36 }
 0x1bb   : > { %v1444_v30 = vpop.f32.mrb[104].mxu0 }
 0x1bc   : > { %v1469_v46 = vadd.f32 %v1444_v30, %v3354_v40  ;;  %v2427_v14 = vpop.f32.mrb[105].mxu0  ;;  %v1558_v27 = vpop.f32.mrb[104].mxu1 }
 0x1bd   : > { %v1447_v60 = vpop.f32.mrb[106].mxu0  ;;  %v2457_v33 = vpop.f32.mrb[105].mxu1 }
 0x1be   : > { %v1470_v10 = vadd.f32 %v1447_v60, %v3356_v37  ;;  %v3396_v1 = vadd.f32 %v1558_v27, %v1469_v46  ;;  %v2428_v3 = vpop.f32.mrb[107].mxu0  ;;  %v1561_v49 = vpop.f32.mrb[106].mxu1 }
 0x1bf   : > { %v2458_v25 = vpop.f32.mrb[107].mxu1 }
 0x1c0   : > { %v3398_v26 = vadd.f32 %v1561_v49, %v1470_v10 }
 0x1c3   : > { %v1452_v42 = vpop.f32.mrb[108].mxu0 }
 0x1c4   : > { %v1471_v6 = vadd.f32 %v1452_v42, %v3360_v53  ;;  %v2431_v32 = vpop.f32.mrb[109].mxu0  ;;  %v1566_v22 = vpop.f32.mrb[108].mxu1 }
 0x1c5   : > { %v1455_v20 = vpop.f32.mrb[110].mxu0  ;;  %v2461_v40 = vpop.f32.mrb[109].mxu1 }
 0x1c6   : > { %v1472_v41 = vadd.f32 %v1455_v20, %v3362_v4  ;;  %v3402_v8 = vadd.f32 %v1566_v22, %v1471_v6  ;;  %v2432_v12 = vpop.f32.mrb[111].mxu0  ;;  %v1569_v37 = vpop.f32.mrb[110].mxu1 }
 0x1c7   : > { %v2462_v43 = vpop.f32.mrb[111].mxu1 }
 0x1c8   : > { %v3404_v48 = vadd.f32 %v1569_v37, %v1472_v41 }
 0x1cb   : > { %v1632_v34 = vpop.f32.mrb[112].mxu0 }
 0x1cc   : > { %v1687_v53 = vadd.f32 %v1632_v34, %v3366_v63  ;;  %v2467_v24 = vpop.f32.mrb[113].mxu0 }
 0x1cd   : > { %v1635_v38 = vpop.f32.mrb[114].mxu0 }
 0x1ce   : > { %v1708_v28 = vadd.f32 %v3409_v21, %v1687_v53  ;;  %v1688_v4 = vadd.f32 %v1635_v38, %v3368_v57  ;;  %v2468_v18 = vpop.f32.mrb[115].mxu0 }
 0x1d0   : > { %v1722_v31 = vmax.f32 %v1708_v28, 0.0  ;;  %v1709_v23 = vadd.f32 %v3409_v21, %v1688_v4 }
 0x1d2   : > { %v1723_v52 = vmax.f32 %v1709_v23, 0.0  ;;  %v1736_v35 = vmin.f32 %v1722_v31, 6.0 }
 0x1d3   : > { %v1640_v59 = vpop.f32.mrb[116].mxu0 }
 0x1d4   : > { %v1737_v44 = vmin.f32 %v1723_v52, 6.0  ;;  %v1689_v39 = vadd.f32 %v1640_v59, %v3372_v9  ;;  %v2471_v15 = vpop.f32.mrb[117].mxu0 }
 0x1d5   : > { %v1643_v11 = vpop.f32.mrb[118].mxu0 }
 0x1d6   : > { %v1750_v19 = vpack.c.bf16 %v1737_v44, %v1736_v35  ;;  %v1710_v63 = vadd.f32 %v3409_v21, %v1689_v39  ;;  %v1690_v45 = vadd.f32 %v1643_v11, %v3374_v29  ;;  %v2472_v0 = vpop.f32.mrb[119].mxu0 }
 0x1d8   : > { %v1724_v51 = vmax.f32 %v1710_v63, 0.0  ;;  %v1711_v57 = vadd.f32 %v3409_v21, %v1690_v45  ;;  %2496 = vmatmul.mubr.msk.bf16.vlgmr.msra.gmra.mrb[112].mxu1 %vm320_vm2, %v1750_v19 }
 0x1d9   : > { %2499 = vmatprep.mubr.msk.bf16.mxu1 %vm2617_vm1, %v2616_v2 }
 0x1da   : > { %v1725_v5 = vmax.f32 %v1711_v57, 0.0  ;;  %v1738_v17 = vmin.f32 %v1724_v51, 6.0 }
 0x1db   : > { %v1648_v7 = vpop.f32.mrb[120].mxu0 }
 0x1dc   : > { %v1739_v9 = vmin.f32 %v1725_v5, 6.0  ;;  %v1691_v16 = vadd.f32 %v1648_v7, %v3378_v54  ;;  %v2475_v36 = vpop.f32.mrb[121].mxu0 }
 0x1dd   : > { %v1651_v55 = vpop.f32.mrb[122].mxu0 }
 0x1de   : > { %v1751_v50 = vpack.c.bf16 %v1739_v9, %v1738_v17  ;;  %v1712_v29 = vadd.f32 %v3409_v21, %v1691_v16  ;;  %v1692_v58 = vadd.f32 %v1651_v55, %v3380_v56  ;;  %v2476_v30 = vpop.f32.mrb[123].mxu0 }
 0x1e0   : > { %v1726_v46 = vmax.f32 %v1712_v29, 0.0  ;;  %v1713_v14 = vadd.f32 %v3409_v21, %v1692_v58  ;;  %2500 = vmatmul.mubr.msk.bf16.gmra.mrb[116].mxu1 %vm320_vm2, %v1751_v50 }
 0x1e1   : > { %2503 = vmatprep.mubr.msk.bf16.mxu1 %vm2617_vm1, %v2616_v2 }
 0x1e2   : > { %v1727_v27 = vmax.f32 %v1713_v14, 0.0  ;;  %v1740_v33 = vmin.f32 %v1726_v46, 6.0 }
 0x1e3   : > { %v1656_v60 = vpop.f32.mrb[124].mxu0 }
 0x1e4   : > { %v1741_v54 = vmin.f32 %v1727_v27, 6.0  ;;  %v1693_v10 = vadd.f32 %v1656_v60, %v3384_v47  ;;  %v2479_v3 = vpop.f32.mrb[125].mxu0 }
 0x1e5   : > { %v1659_v49 = vpop.f32.mrb[126].mxu0 }
 0x1e6   : > { %v1752_v25 = vpack.c.bf16 %v1741_v54, %v1740_v33  ;;  %v1714_v56 = vadd.f32 %v3409_v21, %v1693_v10  ;;  %v1694_v42 = vadd.f32 %v1659_v49, %v3386_v62  ;;  %v2480_v6 = vpop.f32.mrb[127].mxu0 }
 0x1e8   : > { %v1728_v32 = vmax.f32 %v1714_v56, 0.0  ;;  %v1715_v22 = vadd.f32 %v3409_v21, %v1694_v42  ;;  %2504 = vmatmul.mubr.msk.bf16.gmra.mrb[120].mxu1 %vm320_vm2, %v1752_v25 }
 0x1e9   : > { %2507 = vmatprep.mubr.msk.bf16.mxu1 %vm2617_vm1, %v2616_v2 }
 0x1ea   : > { %v1729_v20 = vmax.f32 %v1715_v22, 0.0  ;;  %v1742_v41 = vmin.f32 %v1728_v32, 6.0 }
 0x1eb   : > { %v1664_v40 = vpop.f32.mrb[128].mxu0 }
 0x1ec   : > { %v1743_v47 = vmin.f32 %v1729_v20, 6.0  ;;  %v1695_v12 = vadd.f32 %v1664_v40, %v3390_v61  ;;  %v2483_v37 = vpop.f32.mrb[129].mxu0 }
 0x1ed   : > { %v1667_v43 = vpop.f32.mrb[130].mxu0 }
 0x1ee   : > { %v1753_v34 = vpack.c.bf16 %v1743_v47, %v1742_v41  ;;  %v1716_v62 = vadd.f32 %v3409_v21, %v1695_v12  ;;  %v1696_v53 = vadd.f32 %v1667_v43, %v3392_v13  ;;  %v2484_v24 = vpop.f32.mrb[131].mxu0 }
 0x1f0   : > { %v1730_v38 = vmax.f32 %v1716_v62, 0.0  ;;  %v1717_v28 = vadd.f32 %v3409_v21, %v1696_v53  ;;  %2508 = vmatmul.mubr.msk.bf16.gmra.mrb[124].mxu1 %vm320_vm2, %v1753_v34 }
 0x1f1   : > { %2511 = vmatprep.mubr.msk.bf16.mxu1 %vm2617_vm1, %v2616_v2 }
 0x1f2   : > { %v1731_v4 = vmax.f32 %v1717_v28, 0.0  ;;  %v1744_v31 = vmin.f32 %v1730_v38, 6.0 }
 0x1f3   : > { %v1672_v18 = vpop.f32.mrb[132].mxu0 }
 0x1f4   : > { %v1745_v61 = vmin.f32 %v1731_v4, 6.0  ;;  %v1697_v23 = vadd.f32 %v1672_v18, %v3396_v1  ;;  %v2487_v52 = vpop.f32.mrb[133].mxu0 }
 0x1f5   : > { %v1675_v59 = vpop.f32.mrb[134].mxu0 }
 0x1f6   : > { %v1754_v35 = vpack.c.bf16 %v1745_v61, %v1744_v31  ;;  %v1718_v13 = vadd.f32 %v3409_v21, %v1697_v23  ;;  %v1698_v44 = vadd.f32 %v1675_v59, %v3398_v26  ;;  %v2488_v39 = vpop.f32.mrb[135].mxu0 }
 0x1f8   : > { %v1732_v15 = vmax.f32 %v1718_v13, 0.0  ;;  %v1719_v11 = vadd.f32 %v3409_v21, %v1698_v44  ;;  %2512 = vmatmul.mubr.msk.bf16.gmra.mrb[128].mxu1 %vm320_vm2, %v1754_v35 }
 0x1f9   : > { %2515 = vmatprep.mubr.msk.bf16.mxu1 %vm2617_vm1, %v2616_v2 }
 0x1fa   : > { %v1733_v19 = vmax.f32 %v1719_v11, 0.0  ;;  %v1746_v45 = vmin.f32 %v1732_v15, 6.0 }
 0x1fb   : > { %v1680_v63 = vpop.f32.mrb[136].mxu0 }
 0x1fc   : > { %v1747_v1 = vmin.f32 %v1733_v19, 6.0  ;;  %v1699_v0 = vadd.f32 %v1680_v63, %v3402_v8  ;;  %v2491_v51 = vpop.f32.mrb[137].mxu0 }
 0x1fd   : > { %v1683_v57 = vpop.f32.mrb[138].mxu0 }
 0x1fe   : > { %v1755_v5 = vpack.c.bf16 %v1747_v1, %v1746_v45  ;;  %v1720_v26 = vadd.f32 %v3409_v21, %v1699_v0  ;;  %v1700_v7 = vadd.f32 %v1683_v57, %v3404_v48  ;;  %v2492_v17 = vpop.f32.mrb[139].mxu0  ;;  %v3463_v48 = vld [vmem:[%s3531_s4] ss:$0 sm:$0xff] }
 0x200   : > { %v1734_v9 = vmax.f32 %v1720_v26, 0.0  ;;  %v1721_v16 = vadd.f32 %v3409_v21, %v1700_v7  ;;  %2516 = vmatmul.mubr.msk.bf16.gmra.mrb[132].mxu1 %vm320_vm2, %v1755_v5 }
 0x201   : > { %2519 = vmatprep.mubr.msk.bf16.mxu1 %vm2617_vm1, %v2616_v2 }
 0x202   : > { %v1735_v36 = vmax.f32 %v1721_v16, 0.0  ;;  %v1748_v8 = vmin.f32 %v1734_v9, 6.0 }
 0x204   : > { %v1749_v55 = vmin.f32 %v1735_v36, 6.0 }
 0x206   : > { %v1756_v50 = vpack.c.bf16 %v1749_v55, %v1748_v8 }
 0x208   : > { %2520 = vmatmul.mubr.msk.bf16.gmra.mrb[136].mxu1 %vm320_vm2, %v1756_v50 }
 0x2ab   : > { %v1823_v21 = vpop.f32.mrb[112].mxu1 }
 0x2ac   : > { %v1824_v2 = vadd.f32 %v3463_v48, %v1823_v21  ;;  %v2497_v29 = vpop.f32.mrb[113].mxu1 }
 0x2ad   : > { %v1826_v58 = vpop.f32.mrb[114].mxu1 }
 0x2ae   : > { %v1878_v30 = vmax.f32 %v1824_v2, 0.0  ;;  %v1827_v46 = vadd.f32 %v3463_v48, %v1826_v58  ;;  %v2498_v14 = vpop.f32.mrb[115].mxu1 }
 0x2b0   : > { %v1892_v27 = vmin.f32 %v1878_v30, 6.0  ;;  %v1879_v60 = vmax.f32 %v1827_v46, 0.0 }
 0x2b2   : > { %1907 = vst.msk [vmem:[%s3470_s19] sm:$0xff] %vm1906_vm9, %v1892_v27  ;;  %v1893_v33 = vmin.f32 %v1879_v60, 6.0 }
 0x2b3   : > { %v1831_v54 = vpop.f32.mrb[116].mxu1 }
 0x2b4   : > { %1909 = vst.msk [vmem:[%s3470_s19 + $0x8] sm:$0x3f] %vm1908_vm10, %v1893_v33  ;;  %v1832_v10 = vadd.f32 %v3463_v48, %v1831_v54  ;;  %v2501_v3 = vpop.f32.mrb[117].mxu1 }
 0x2b5   : > { %v1834_v49 = vpop.f32.mrb[118].mxu1 }
 0x2b6   : > { %v1880_v25 = vmax.f32 %v1832_v10, 0.0  ;;  %v1835_v56 = vadd.f32 %v3463_v48, %v1834_v49  ;;  %v2502_v42 = vpop.f32.mrb[119].mxu1 }
 0x2b8   : > { %v1894_v6 = vmin.f32 %v1880_v25, 6.0  ;;  %v1881_v32 = vmax.f32 %v1835_v56, 0.0 }
 0x2ba   : > { %1910 = vst.msk [vmem:[%s3470_s19 + $0x10] sm:$0xff] %vm1906_vm9, %v1894_v6  ;;  %v1895_v22 = vmin.f32 %v1881_v32, 6.0 }
 0x2bb   : > { %v1839_v20 = vpop.f32.mrb[120].mxu1 }
 0x2bc   : > { %1911 = vst.msk [vmem:[%s3470_s19 + $0x18] sm:$0x3f] %vm1908_vm10, %v1895_v22  ;;  %v1840_v40 = vadd.f32 %v3463_v48, %v1839_v20  ;;  %v2505_v41 = vpop.f32.mrb[121].mxu1 }
 0x2bd   : > { %v1842_v47 = vpop.f32.mrb[122].mxu1 }
 0x2be   : > { %v1882_v12 = vmax.f32 %v1840_v40, 0.0  ;;  %v1843_v37 = vadd.f32 %v3463_v48, %v1842_v47  ;;  %v2506_v43 = vpop.f32.mrb[123].mxu1 }
 0x2c0   : > { %v1896_v34 = vmin.f32 %v1882_v12, 6.0  ;;  %v1883_v62 = vmax.f32 %v1843_v37, 0.0 }
 0x2c2   : > { %1912 = vst.msk [vmem:[%s3470_s19 + $0x20] sm:$0xff] %vm1906_vm9, %v1896_v34  ;;  %v1897_v53 = vmin.f32 %v1883_v62, 6.0 }
 0x2c3   : > { %v1847_v24 = vpop.f32.mrb[124].mxu1 }
 0x2c4   : > { %1913 = vst.msk [vmem:[%s3470_s19 + $0x28] sm:$0x3f] %vm1908_vm10, %v1897_v53  ;;  %v1848_v38 = vadd.f32 %v3463_v48, %v1847_v24  ;;  %v2509_v28 = vpop.f32.mrb[125].mxu1 }
 0x2c5   : > { %v1850_v4 = vpop.f32.mrb[126].mxu1 }
 0x2c6   : > { %v1884_v18 = vmax.f32 %v1848_v38, 0.0  ;;  %v1851_v31 = vadd.f32 %v3463_v48, %v1850_v4  ;;  %v2510_v61 = vpop.f32.mrb[127].mxu1 }
 0x2c8   : > { %v1898_v23 = vmin.f32 %v1884_v18, 6.0  ;;  %v1885_v52 = vmax.f32 %v1851_v31, 0.0 }
 0x2ca   : > { %1914 = vst.msk [vmem:[%s3470_s19 + $0x30] sm:$0xff] %vm1906_vm9, %v1898_v23  ;;  %v1899_v59 = vmin.f32 %v1885_v52, 6.0 }
 0x2cb   : > { %v1855_v35 = vpop.f32.mrb[128].mxu1 }
 0x2cc   : > { %1915 = vst.msk [vmem:[%s3470_s19 + $0x38] sm:$0x3f] %vm1908_vm10, %v1899_v59  ;;  %v1856_v13 = vadd.f32 %v3463_v48, %v1855_v35  ;;  %v2513_v44 = vpop.f32.mrb[129].mxu1 }
 0x2cd   : > { %v1858_v39 = vpop.f32.mrb[130].mxu1 }
 0x2ce   : > { %v1886_v15 = vmax.f32 %v1856_v13, 0.0  ;;  %v1859_v11 = vadd.f32 %v3463_v48, %v1858_v39  ;;  %v2514_v19 = vpop.f32.mrb[131].mxu1 }
 0x2d0   : > { %v1900_v63 = vmin.f32 %v1886_v15, 6.0  ;;  %v1887_v45 = vmax.f32 %v1859_v11, 0.0 }
 0x2d2   : > { %1916 = vst.msk [vmem:[%s3470_s19 + $0x40] sm:$0xff] %vm1906_vm9, %v1900_v63  ;;  %v1901_v1 = vmin.f32 %v1887_v45, 6.0 }
 0x2d3   : > { %v1863_v0 = vpop.f32.mrb[132].mxu1 }
 0x2d4   : > { %1917 = vst.msk [vmem:[%s3470_s19 + $0x48] sm:$0x3f] %vm1908_vm10, %v1901_v1  ;;  %v1864_v51 = vadd.f32 %v3463_v48, %v1863_v0  ;;  %v2517_v57 = vpop.f32.mrb[133].mxu1 }
 0x2d5   : > { %v1866_v5 = vpop.f32.mrb[134].mxu1 }
 0x2d6   : > { %v1888_v26 = vmax.f32 %v1864_v51, 0.0  ;;  %v1867_v7 = vadd.f32 %v3463_v48, %v1866_v5  ;;  %v2518_v17 = vpop.f32.mrb[135].mxu1 }
 0x2d8   : > { %v1902_v9 = vmin.f32 %v1888_v26, 6.0  ;;  %v1889_v16 = vmax.f32 %v1867_v7, 0.0 }
 0x2da   : > { %1918 = vst.msk [vmem:[%s3470_s19 + $0x50] sm:$0xff] %vm1906_vm9, %v1902_v9  ;;  %v1903_v36 = vmin.f32 %v1889_v16, 6.0 }
 0x2db   : > { %v1871_v8 = vpop.f32.mrb[136].mxu1 }
 0x2dc   : > { %1919 = vst.msk [vmem:[%s3470_s19 + $0x58] sm:$0x3f] %vm1908_vm10, %v1903_v36  ;;  %v1872_v55 = vadd.f32 %v3463_v48, %v1871_v8  ;;  %v2521_v50 = vpop.f32.mrb[137].mxu1 }
 0x2dd   : > { %v1874_v21 = vpop.f32.mrb[138].mxu1 }
 0x2de   : > { %v1890_v2 = vmax.f32 %v1872_v55, 0.0  ;;  %v1875_v29 = vadd.f32 %v3463_v48, %v1874_v21  ;;  %v2522_v58 = vpop.f32.mrb[139].mxu1 }
 0x2e0   : > { %v1904_v30 = vmin.f32 %v1890_v2, 6.0  ;;  %v1891_v46 = vmax.f32 %v1875_v29, 0.0 }
 0x2e2   : > { %1920 = vst.msk [vmem:[%s3470_s19 + $0x60] sm:$0xff] %vm1906_vm9, %v1904_v30  ;;  %v1905_v14 = vmin.f32 %v1891_v46, 6.0 }
 0x2e4   : > { %1921 = vst.msk [vmem:[%s3470_s19 + $0x68] sm:$0x3f] %vm1908_vm10, %v1905_v14 }
 0x2e5 PF: > { %s15_s22 = sadd.s32 1, %s2614_s22   ;;  %s3537_s18 = smov %s2606_s20 }
 0x2e6   : > { %p12_p7 = scmp.ge.s32.totalorder %s15_s22, 6   ;;  %s3538_s19 = smov %s2610_s21 }
 0x2e7   : > { %s3539_s20 = smov %s3542_s23  ;;  %s3540_s21 = smov %s3546_s24 }
 0x2e8   :  { %14 = sbr.rel (!%p12_p7) target bundleno = 3 (0x3), region = 79 }

</bundles_post_ra>
